<compile_context>
chip_gen: v5e
topology: v5e:2x2
jax: 0.10.0
libtpu: 0.0.40
codegen_flags: <defaults>
</compile_context>

<pallas_src>
import functools

import jax
import jax.numpy as jnp
from jax.experimental import pallas as pl
from jax.experimental.pallas import tpu as pltpu


_VMEM_LIMIT = 32 * 1024 * 1024    # scoped limit: v7x has only 64 MiB/TC
_VMEM_BUDGET = 20 * 1024 * 1024   # target per-step working set (double-buffered)
_LN_EPS = 1e-5                    # RoBERTa-style layer_norm_eps


# ----------------------------- tiling helpers -------------------------------

def _pick_tile(dim, target):
    """Largest tile <= target that divides dim (multiples of 128 preferred)."""
    if dim <= target:
        return dim
    if dim % target == 0:
        return target
    t = (target // 128) * 128
    while t >= 128:
        if dim % t == 0:
            return t
        t -= 128
    return dim


def _row_tile(m, target=256):
    """Row-tile size; caller pads rows up to a multiple of the result."""
    return m if m <= target else target


def _pad_rows(a, mp):
    if a.shape[0] == mp:
        return a
    pads = [(0, mp - a.shape[0])] + [(0, 0)] * (a.ndim - 1)
    return jnp.pad(a, pads)


# ------------------------------ Pallas kernels ------------------------------

def _linear_kernel(x_ref, w_ref, b_ref, o_ref, acc_ref, *, activation):
    # gridded matmul: grid=(M//tm, N//tn, K//tk); acc is (tm, tn) f32 scratch.
    k = pl.program_id(2)

    @pl.when(k == 0)
    def _init():
        acc_ref[...] = jnp.zeros_like(acc_ref)

    acc_ref[...] += jnp.dot(x_ref[...], w_ref[...],
                            preferred_element_type=jnp.float32)

    @pl.when(k == pl.num_programs(2) - 1)
    def _epilogue():
        y = acc_ref[...] + b_ref[...]
        if activation == "gelu":
            y = jax.nn.gelu(y, approximate=True)
        elif activation == "relu":
            y = jnp.maximum(y, 0.0)
        o_ref[...] = y.astype(o_ref.dtype)


def _qkv_kernel(x_ref, w_ref, b_ref, q_ref, k_ref, v_ref, acc_ref, *, hidden):
    # Fused QKV projection with full-N (3H) accumulator; epilogue splits the
    # accumulator into three lane-dense (tm, H) bf16 outputs (no HBM split).
    kk = pl.program_id(1)

    @pl.when(kk == 0)
    def _init():
        acc_ref[...] = jnp.zeros_like(acc_ref)

    acc_ref[...] += jnp.dot(x_ref[...], w_ref[...],
                            preferred_element_type=jnp.float32)

    @pl.when(kk == pl.num_programs(1) - 1)
    def _epilogue():
        y = acc_ref[...] + b_ref[...]
        q_ref[...] = y[:, :hidden].astype(q_ref.dtype)
        k_ref[...] = y[:, hidden:2 * hidden].astype(k_ref.dtype)
        v_ref[...] = y[:, 2 * hidden:].astype(v_ref.dtype)


def _linear_res_ln_kernel(x_ref, w_ref, b_ref, res_ref, g_ref, beta_ref,
                          o_ref, acc_ref):
    # matmul + bias + residual add + LayerNorm fused in the epilogue.
    # grid=(M//tm, K//tk); full N per tile so LN can reduce over the last dim.
    k = pl.program_id(1)

    @pl.when(k == 0)
    def _init():
        acc_ref[...] = jnp.zeros_like(acc_ref)

    acc_ref[...] += jnp.dot(x_ref[...], w_ref[...],
                            preferred_element_type=jnp.float32)

    @pl.when(k == pl.num_programs(1) - 1)
    def _epilogue():
        y = acc_ref[...] + b_ref[...] + res_ref[...].astype(jnp.float32)
        mu = jnp.mean(y, axis=-1, keepdims=True)
        var = jnp.mean((y - mu) ** 2, axis=-1, keepdims=True)
        o_ref[...] = ((y - mu) * jax.lax.rsqrt(var + _LN_EPS)
                      * g_ref[...] + beta_ref[...]).astype(o_ref.dtype)


def _layernorm_kernel(x_ref, g_ref, b_ref, o_ref):
    y = x_ref[...]
    mu = jnp.mean(y, axis=-1, keepdims=True)
    var = jnp.mean((y - mu) ** 2, axis=-1, keepdims=True)
    o_ref[...] = ((y - mu) * jax.lax.rsqrt(var + _LN_EPS)
                  * g_ref[...] + b_ref[...]).astype(o_ref.dtype)


def _attention_kernel(q_ref, k_ref, v_ref, mask_ref, o_ref, *, heads, head_dim):
    # One (batch, head-group) per grid step.  q/k/v blocks: (1, T, gd) bf16,
    # gd = heads*head_dim (multiple of 128 lanes or the whole hidden dim).
    # Additive -1e9 mask is built in-kernel from the (B,1,T) attention mask.
    qg = q_ref[0]                                  # (T, gd) bf16
    kg = k_ref[0]
    vg = v_ref[0]
    bias = (1.0 - mask_ref[0]) * (-1e9)            # (1, T) f32
    scale = 1.0 / (float(head_dim) ** 0.5)
    kt = kg.T                                      # one transpose per group

    outs = []
    for h in range(heads):
        lo, hi = h * head_dim, (h + 1) * head_dim
        # fold the 1/sqrt(dh) scale into Q (T*dh muls instead of T*T)
        q = (qg[:, lo:hi].astype(jnp.float32) * scale).astype(jnp.bfloat16)
        s = jnp.dot(q, kt[lo:hi, :], preferred_element_type=jnp.float32)
        s = s + bias                               # broadcast (1,T) -> (T,T)
        m = jnp.max(s, axis=-1, keepdims=True)
        p = jnp.exp(s - m)
        p = p * pl.reciprocal(jnp.sum(p, axis=-1, keepdims=True), approx=True)
        outs.append(jnp.dot(p.astype(jnp.bfloat16), vg[:, lo:hi],
                            preferred_element_type=jnp.float32))
    ctx = outs[0] if heads == 1 else jnp.concatenate(outs, axis=-1)
    o_ref[0] = ctx.astype(o_ref.dtype)             # lane-dense (T, gd) store


def _masked_mean_kernel(x_ref, m_ref, o_ref):
    # Matches torch: (embeddings * padding_mask).mean(dim=1)  -> divide by T.
    x = x_ref[...].astype(jnp.float32)             # (1, T, H)
    m = m_ref[...]                                  # (1, T, 1)
    o_ref[...] = jnp.sum(x * m, axis=1, keepdims=True) * (1.0 / x.shape[1])


def _mlp_mse_kernel(x_ref, labels_ref, *refs, n_lin):
    # Whole MLP head + MSE loss fused in one call (all weights fit VMEM).
    # TODO(synk): dropout layers of the torch MLP are identity at inference.
    wb = refs[:2 * n_lin]
    logits_ref = refs[2 * n_lin]
    loss_ref = refs[2 * n_lin + 1]

    h = x_ref[...].astype(jnp.float32)
    for i in range(n_lin):
        w = wb[2 * i][...]
        b = wb[2 * i + 1][...]
        h = jnp.dot(h.astype(jnp.bfloat16), w,
                    preferred_element_type=jnp.float32) + b
        if i < n_lin - 1:
            h = jnp.maximum(h, 0.0)
    logits_ref[...] = h

    d = h - labels_ref[...]
    sq = d * d
    tot = jnp.sum(jnp.sum(sq, axis=-1, keepdims=True), axis=0, keepdims=True)
    loss_ref[...] = tot * (1.0 / sq.size)


# ------------------------------ kernel wrappers ------------------------------

def _linear(x, w, b, activation=None):
    x = x.astype(jnp.bfloat16)
    M, K = x.shape
    N = w.shape[1]
    tm = _row_tile(M, 256)
    mp = ((M + tm - 1) // tm) * tm
    xp = _pad_rows(x, mp)
    tk = _pick_tile(K, 512)
    # full-N output tile when the weight + accumulator + buffers fit VMEM
    full_n_bytes = (2 * tm * tk * 2 + 2 * tk * N * 2 + 2 * tm * N * 2
                    + tm * N * 4 + 2 * N * 4)
    tn = N if full_n_bytes <= _VMEM_BUDGET else _pick_tile(N, 512)

    kernel = functools.partial(_linear_kernel, activation=activation)
    out = pl.pallas_call(
        kernel,
        out_shape=jax.ShapeDtypeStruct((mp, N), jnp.bfloat16),
        grid_spec=pltpu.PrefetchScalarGridSpec(
            num_scalar_prefetch=0,
            grid=(mp // tm, N // tn, K // tk),
            in_specs=[
                pl.BlockSpec((tm, tk), lambda i, j, k: (i, k)),
                pl.BlockSpec((tk, tn), lambda i, j, k: (k, j)),
                pl.BlockSpec((1, tn), lambda i, j, k: (0, j)),
            ],
            out_specs=pl.BlockSpec((tm, tn), lambda i, j, k: (i, j)),
            scratch_shapes=[pltpu.VMEM((tm, tn), jnp.float32)],
        ),
        compiler_params=pltpu.CompilerParams(
            dimension_semantics=("parallel", "parallel", "arbitrary"),
            vmem_limit_bytes=_VMEM_LIMIT),
    )(xp, w, b)
    return out[:M] if mp != M else out


def _qkv_linear(x, w, b, hidden):
    x = x.astype(jnp.bfloat16)
    M, K = x.shape
    N3 = w.shape[1]
    tm = _row_tile(M, 256)
    mp = ((M + tm - 1) // tm) * tm
    xp = _pad_rows(x, mp)
    tk = _pick_tile(K, 512)
    for tgt in (512, 256, 128):          # shrink tk if the 3H slab is too big
        tk = _pick_tile(K, tgt)
        est = (2 * tm * tk * 2 + 2 * tk * N3 * 2 + 6 * tm * hidden * 2
               + tm * N3 * 4 + 2 * N3 * 4)
        if est <= _VMEM_BUDGET:
            break

    kernel = functools.partial(_qkv_kernel, hidden=hidden)
    out_sd = jax.ShapeDtypeStruct((mp, hidden), jnp.bfloat16)
    q, k, v = pl.pallas_call(
        kernel,
        out_shape=(out_sd, out_sd, out_sd),
        grid_spec=pltpu.PrefetchScalarGridSpec(
            num_scalar_prefetch=0,
            grid=(mp // tm, K // tk),
            in_specs=[
                pl.BlockSpec((tm, tk), lambda i, kk: (i, kk)),
                pl.BlockSpec((tk, N3), lambda i, kk: (kk, 0)),
                pl.BlockSpec((1, N3), lambda i, kk: (0, 0)),
            ],
            out_specs=(
                pl.BlockSpec((tm, hidden), lambda i, kk: (i, 0)),
                pl.BlockSpec((tm, hidden), lambda i, kk: (i, 0)),
                pl.BlockSpec((tm, hidden), lambda i, kk: (i, 0)),
            ),
            scratch_shapes=[pltpu.VMEM((tm, N3), jnp.float32)],
        ),
        compiler_params=pltpu.CompilerParams(
            dimension_semantics=("parallel", "arbitrary"),
            vmem_limit_bytes=_VMEM_LIMIT),
    )(xp, w, b)
    if mp != M:
        q, k, v = q[:M], k[:M], v[:M]
    return q, k, v


def _linear_residual_ln(x, w, b, res, gamma, beta):
    x = x.astype(jnp.bfloat16)
    res = res.astype(jnp.bfloat16)
    M, K = x.shape
    N = w.shape[1]
    tm = _row_tile(M, 256)
    mp = ((M + tm - 1) // tm) * tm
    xp = _pad_rows(x, mp)
    rp = _pad_rows(res, mp)
    tk = _pick_tile(K, 512)

    out = pl.pallas_call(
        _linear_res_ln_kernel,
        out_shape=jax.ShapeDtypeStruct((mp, N), jnp.bfloat16),
        grid_spec=pltpu.PrefetchScalarGridSpec(
            num_scalar_prefetch=0,
            grid=(mp // tm, K // tk),
            in_specs=[
                pl.BlockSpec((tm, tk), lambda i, k: (i, k)),
                pl.BlockSpec((tk, N), lambda i, k: (k, 0)),
                pl.BlockSpec((1, N), lambda i, k: (0, 0)),
                pl.BlockSpec((tm, N), lambda i, k: (i, 0)),
                pl.BlockSpec((1, N), lambda i, k: (0, 0)),
                pl.BlockSpec((1, N), lambda i, k: (0, 0)),
            ],
            out_specs=pl.BlockSpec((tm, N), lambda i, k: (i, 0)),
            scratch_shapes=[pltpu.VMEM((tm, N), jnp.float32)],
        ),
        compiler_params=pltpu.CompilerParams(
            dimension_semantics=("parallel", "arbitrary"),
            vmem_limit_bytes=_VMEM_LIMIT),
    )(xp, w, b, rp, gamma, beta)
    return out[:M] if mp != M else out


def _layernorm(x, gamma, beta):
    M, N = x.shape
    tm = _row_tile(M, 512)
    mp = ((M + tm - 1) // tm) * tm
    xp = _pad_rows(x, mp)
    out = pl.pallas_call(
        _layernorm_kernel,
        out_shape=jax.ShapeDtypeStruct((mp, N), jnp.bfloat16),
        grid_spec=pltpu.PrefetchScalarGridSpec(
            num_scalar_prefetch=0,
            grid=(mp // tm,),
            in_specs=[
                pl.BlockSpec((tm, N), lambda i: (i, 0)),
                pl.BlockSpec((1, N), lambda i: (0, 0)),
                pl.BlockSpec((1, N), lambda i: (0, 0)),
            ],
            out_specs=pl.BlockSpec((tm, N), lambda i: (i, 0)),
        ),
        compiler_params=pltpu.CompilerParams(
            dimension_semantics=("parallel",),
            vmem_limit_bytes=_VMEM_LIMIT),
    )(xp, gamma, beta)
    return out[:M] if mp != M else out


def _attention(q_bth, k_bth, v_bth, mask_b1t, n_heads, head_dim, hidden):
    B, T, _ = q_bth.shape
    # Head-group width: multiple of 128 lanes when possible, else whole hidden.
    if head_dim % 128 == 0:
        hpg = 1
    elif 128 % head_dim == 0 and n_heads % (128 // head_dim) == 0:
        hpg = 128 // head_dim
    else:
        hpg = n_heads
    gd = hpg * head_dim
    n_groups = n_heads // hpg

    kernel = functools.partial(_attention_kernel, heads=hpg, head_dim=head_dim)
    return pl.pallas_call(
        kernel,
        out_shape=jax.ShapeDtypeStruct((B, T, hidden), jnp.bfloat16),
        grid_spec=pltpu.PrefetchScalarGridSpec(
            num_scalar_prefetch=0,
            grid=(B, n_groups),
            in_specs=[
                pl.BlockSpec((1, T, gd), lambda b, g: (b, 0, g)),
                pl.BlockSpec((1, T, gd), lambda b, g: (b, 0, g)),
                pl.BlockSpec((1, T, gd), lambda b, g: (b, 0, g)),
                pl.BlockSpec((1, 1, T), lambda b, g: (b, 0, 0)),
            ],
            out_specs=pl.BlockSpec((1, T, gd), lambda b, g: (b, 0, g)),
        ),
        compiler_params=pltpu.CompilerParams(
            dimension_semantics=("parallel", "parallel"),
            vmem_limit_bytes=_VMEM_LIMIT),
    )(q_bth, k_bth, v_bth, mask_b1t)


def _masked_mean(x_bth, mask_bt1):
    B, T, H = x_bth.shape
    out = pl.pallas_call(
        _masked_mean_kernel,
        out_shape=jax.ShapeDtypeStruct((B, 1, H), jnp.float32),
        grid_spec=pltpu.PrefetchScalarGridSpec(
            num_scalar_prefetch=0,
            grid=(B,),
            in_specs=[
                pl.BlockSpec((1, T, H), lambda b: (b, 0, 0)),
                pl.BlockSpec((1, T, 1), lambda b: (b, 0, 0)),
            ],
            out_specs=pl.BlockSpec((1, 1, H), lambda b: (b, 0, 0)),
        ),
        compiler_params=pltpu.CompilerParams(
            dimension_semantics=("parallel",),
            vmem_limit_bytes=_VMEM_LIMIT),
    )(x_bth, mask_bt1)
    return out.reshape(B, H)


def _mlp_mse(x, labels, mlp_params):
    n_lin = len(mlp_params)
    B = x.shape[0]
    ntoken = mlp_params[-1]["w"].shape[1]
    args = [x.astype(jnp.float32), labels.astype(jnp.float32)]
    for layer in mlp_params:
        args += [layer["w"], layer["b"]]
    vm = pl.BlockSpec(memory_space=pltpu.MemorySpace.VMEM)
    kernel = functools.partial(_mlp_mse_kernel, n_lin=n_lin)
    logits, loss = pl.pallas_call(
        kernel,
        out_shape=(jax.ShapeDtypeStruct((B, ntoken), jnp.float32),
                   jax.ShapeDtypeStruct((1, 1), jnp.float32)),
        in_specs=[vm] * len(args),
        out_specs=(vm, vm),
        compiler_params=pltpu.CompilerParams(vmem_limit_bytes=_VMEM_LIMIT),
    )(*args)
    return loss[0, 0], logits


# -------------------------------- parameters --------------------------------

def init_encoder_params(key, vocab_size, max_pos, hidden, n_layers, n_heads,
                        inter):
    del n_heads  # head split is handled inside the attention kernel
    keys = jax.random.split(key, 3 + n_layers)
    s = 0.02
    bf16 = jnp.bfloat16
    params = {
        "word_emb": s * jax.random.normal(keys[0], (vocab_size, hidden), jnp.float32),
        "pos_emb": s * jax.random.normal(keys[1], (max_pos, hidden), jnp.float32),
        "type_emb": s * jax.random.normal(keys[2], (1, hidden), jnp.float32),
        "emb_ln_g": jnp.ones((1, hidden), jnp.float32),
        "emb_ln_b": jnp.zeros((1, hidden), jnp.float32),
        "layers": [],
    }
    for li in range(n_layers):
        lk = jax.random.split(keys[3 + li], 4)
        layer = {
            # fused QKV projection: one (H, 3H) weight -> single MXU pass.
            "wqkv": (s * jax.random.normal(lk[0], (hidden, 3 * hidden),
                                           jnp.float32)).astype(bf16),
            "bqkv": jnp.zeros((1, 3 * hidden), jnp.float32),
            "wo": (s * jax.random.normal(lk[1], (hidden, hidden),
                                         jnp.float32)).astype(bf16),
            "bo": jnp.zeros((1, hidden), jnp.float32),
            "ln1_g": jnp.ones((1, hidden), jnp.float32),
            "ln1_b": jnp.zeros((1, hidden), jnp.float32),
            "wi": (s * jax.random.normal(lk[2], (hidden, inter),
                                         jnp.float32)).astype(bf16),
            "bi": jnp.zeros((1, inter), jnp.float32),
            "wo2": (s * jax.random.normal(lk[3], (inter, hidden),
                                          jnp.float32)).astype(bf16),
            "bo2": jnp.zeros((1, hidden), jnp.float32),
            "ln2_g": jnp.ones((1, hidden), jnp.float32),
            "ln2_b": jnp.zeros((1, hidden), jnp.float32),
        }
        params["layers"].append(layer)
    return params


def init_mlp_params(key, ninp, nhid, nlayers, ntoken):
    n_lin = nlayers + 2
    keys = jax.random.split(key, n_lin)
    dims = [ninp] + [nhid] * (nlayers + 1) + [ntoken]
    layers = []
    for i in range(n_lin):
        layers.append({
            "w": (0.02 * jax.random.normal(keys[i], (dims[i], dims[i + 1]),
                                           jnp.float32)).astype(jnp.bfloat16),
            "b": jnp.zeros((1, dims[i + 1]), jnp.float32),
        })
    return layers


# -------------------------------- forward pass -------------------------------

def encoder_forward(params, input_ids, attention_mask, n_heads,
                    pooling_type="mean"):
    f32 = jnp.float32
    B, T = input_ids.shape
    H = params["word_emb"].shape[1]
    dh = H // n_heads

    # embeddings (gather is glue; LayerNorm is a Pallas kernel emitting bf16)
    # TODO(synk): RoBERTa uses a padding-offset position-id scheme; pos_emb[:T]
    # is a simplification consistent with synthetic weights.
    x = (params["word_emb"][input_ids]
         + params["pos_emb"][:T][None, :, :]
         + params["type_emb"][0][None, None, :]).astype(f32)
    h = _layernorm(x.reshape(B * T, H), params["emb_ln_g"], params["emb_ln_b"])

    mask_b1t = attention_mask.astype(f32).reshape(B, 1, T)

    for layer in params["layers"]:
        # fused QKV projection -> three (B*T, H) bf16 tensors (split in-kernel)
        q, k, v = _qkv_linear(h, layer["wqkv"], layer["bqkv"], H)
        # per-(batch, head-group) attention; additive mask built in-kernel
        ctx = _attention(q.reshape(B, T, H), k.reshape(B, T, H),
                         v.reshape(B, T, H), mask_b1t, n_heads, dh, H)
        # output projection + bias + residual + LayerNorm fused
        h = _linear_residual_ln(ctx.reshape(B * T, H), layer["wo"], layer["bo"],
                                h, layer["ln1_g"], layer["ln1_b"])
        # FFN: matmul + GELU fused, then matmul + residual + LayerNorm fused
        inter = _linear(h, layer["wi"], layer["bi"], activation="gelu")
        h = _linear_residual_ln(inter, layer["wo2"], layer["bo2"],
                                h, layer["ln2_g"], layer["ln2_b"])

    last_hidden = h.reshape(B, T, H)      # == output.last_hidden_state (bf16)

    if pooling_type == "mean":
        # torch: (embeddings * padding_mask).mean(dim=1).squeeze()
        pooled = _masked_mean(last_hidden,
                              attention_mask.astype(f32).reshape(B, T, 1))
        return jnp.squeeze(pooled)
    elif pooling_type == "first":
        return last_hidden[:, 0, :].astype(f32)
    return last_hidden


def perturb_model_forward(params, labels, chem_input_ids, chem_attention_mask,
                          cell_input_ids, cell_attention_mask, n_heads):
    # TODO(synk): gene_backbone / dosage_backbone / TransformerDecoder pooling
    # and PerturbationLoss branches are not exercised (config = MLP + MSE).
    chem_emb = encoder_forward(params["chem"], chem_input_ids,
                               chem_attention_mask, n_heads, "mean")
    cell_emb = encoder_forward(params["cell"], cell_input_ids,
                               cell_attention_mask, n_heads, "mean")
    # pack((chem_embedding, cell_embedding), 'b *')
    emb = jnp.concatenate([chem_emb, cell_emb], axis=-1)
    # MLP head + MSE loss fused into one pallas_call
    loss, logits = _mlp_mse(emb, labels, params["mlp"])
    return loss, jnp.squeeze(logits)


# ----------------------------------- main ------------------------------------

if __name__ == "__main__":
    B, T = 2, 8
    HIDDEN, N_HEADS, INTER, N_LAYERS = 32, 4, 64, 2
    VOCAB, MAX_POS = 50, 16
    MLP_HID, MLP_LAYERS, NTOKEN = 64, 1, 8

    key = jax.random.PRNGKey(0)
    k_chem, k_cell, k_mlp, k_ids1, k_ids2, k_lab = jax.random.split(key, 6)

    params = {
        "chem": init_encoder_params(k_chem, VOCAB, MAX_POS, HIDDEN, N_LAYERS,
                                    N_HEADS, INTER),
        "cell": init_encoder_params(k_cell, VOCAB, MAX_POS, HIDDEN, N_LAYERS,
                                    N_HEADS, INTER),
        "mlp": init_mlp_params(k_mlp, ninp=2 * HIDDEN, nhid=MLP_HID,
                               nlayers=MLP_LAYERS, ntoken=NTOKEN),
    }

    chem_ids = jax.random.randint(k_ids1, (B, T), 0, VOCAB, dtype=jnp.int32)
    cell_ids = jax.random.randint(k_ids2, (B, T), 0, VOCAB, dtype=jnp.int32)
    # second chem sequence has 3 padding positions at the end
    chem_mask = jnp.array([[1, 1, 1, 1, 1, 1, 1, 1],
                           [1, 1, 1, 1, 1, 0, 0, 0]], dtype=jnp.int32)
    cell_mask = jnp.ones((B, T), dtype=jnp.int32)
    labels = jax.random.normal(k_lab, (B, NTOKEN), dtype=jnp.float32)

    fwd = jax.jit(functools.partial(perturb_model_forward, n_heads=N_HEADS))
    loss, logits = fwd(params, labels, chem_ids, chem_mask, cell_ids, cell_mask)
    loss = jax.block_until_ready(loss)
    logits = jax.block_until_ready(logits)

    assert logits.shape == (B, NTOKEN), logits.shape
    assert bool(jnp.isfinite(loss))
    assert bool(jnp.all(jnp.isfinite(logits)))
    # TODO(synk): real ChemBERTa checkpoint weights cannot be loaded here;
    # parameters are synthetic but shapes/semantics match the module forward.
    print("KERNEL_OK")
</pallas_src>

<mosaic_0001>
module attributes {stable_mosaic.version = 11 : i64} {
  func.func @_layernorm_kernel(%arg0: i32, %arg1: memref<16x32xf32, #tpu.memory_space<vmem>>, %arg2: memref<1x32xf32, #tpu.memory_space<vmem>>, %arg3: memref<1x32xf32, #tpu.memory_space<vmem>>, %arg4: memref<16x32xbf16, #tpu.memory_space<vmem>>) attributes {dimension_semantics = [#tpu.dimension_semantics<parallel>], iteration_bounds = array<i64: 1>, scalar_prefetch = 0 : i64, scratch_operands = 0 : i64, tpu.core_type = #tpu.core_type<tc>, window_params = [{transform_indices = @transform_0, window_bounds = array<i64: 16, 32>}, {pipeline_mode = #tpu.pipeline_mode<synchronous>, transform_indices = @transform_1, window_bounds = array<i64: 1, 32>}, {pipeline_mode = #tpu.pipeline_mode<synchronous>, transform_indices = @transform_2, window_bounds = array<i64: 1, 32>}, {transform_indices = @transform_3, window_bounds = array<i64: 16, 32>}]} {
    %c0 = arith.constant 0 : index
    %c0_0 = arith.constant 0 : index
    %0 = vector.load %arg1[%c0, %c0_0] : memref<16x32xf32, #tpu.memory_space<vmem>>, vector<16x32xf32>
    %cst = arith.constant dense<0.000000e+00> : vector<16xf32>
    %1 = vector.multi_reduction <add>, %0, %cst [1] : vector<16x32xf32> to vector<16xf32>
    %2 = vector.shape_cast %1 : vector<16xf32> to vector<16x1xf32>
    %cst_1 = arith.constant 3.200000e+01 : f32
    %3 = vector.broadcast %cst_1 : f32 to vector<16x1xf32>
    %4 = arith.divf %2, %3 : vector<16x1xf32>
    %5 = vector.broadcast %4 : vector<16x1xf32> to vector<16x32xf32>
    %6 = arith.subf %0, %5 : vector<16x32xf32>
    %7 = arith.mulf %6, %6 : vector<16x32xf32>
    %cst_2 = arith.constant dense<0.000000e+00> : vector<16xf32>
    %8 = vector.multi_reduction <add>, %7, %cst_2 [1] : vector<16x32xf32> to vector<16xf32>
    %9 = vector.shape_cast %8 : vector<16xf32> to vector<16x1xf32>
    %cst_3 = arith.constant 3.200000e+01 : f32
    %10 = vector.broadcast %cst_3 : f32 to vector<16x1xf32>
    %11 = arith.divf %9, %10 : vector<16x1xf32>
    %12 = vector.broadcast %4 : vector<16x1xf32> to vector<16x32xf32>
    %13 = arith.subf %0, %12 : vector<16x32xf32>
    %cst_4 = arith.constant 9.99999974E-6 : f32
    %14 = vector.broadcast %cst_4 : f32 to vector<16x1xf32>
    %15 = arith.addf %11, %14 : vector<16x1xf32>
    %16 = math.rsqrt %15 : vector<16x1xf32>
    %17 = vector.broadcast %16 : vector<16x1xf32> to vector<16x32xf32>
    %18 = arith.mulf %13, %17 : vector<16x32xf32>
    %c0_5 = arith.constant 0 : index
    %c0_6 = arith.constant 0 : index
    %19 = vector.load %arg2[%c0_5, %c0_6] : memref<1x32xf32, #tpu.memory_space<vmem>>, vector<1x32xf32>
    %20 = vector.broadcast %19 : vector<1x32xf32> to vector<16x32xf32>
    %21 = arith.mulf %18, %20 : vector<16x32xf32>
    %c0_7 = arith.constant 0 : index
    %c0_8 = arith.constant 0 : index
    %22 = vector.load %arg3[%c0_7, %c0_8] : memref<1x32xf32, #tpu.memory_space<vmem>>, vector<1x32xf32>
    %23 = vector.broadcast %22 : vector<1x32xf32> to vector<16x32xf32>
    %24 = arith.addf %21, %23 : vector<16x32xf32>
    %25 = arith.truncf %24 : vector<16x32xf32> to vector<16x32xbf16>
    %c0_9 = arith.constant 0 : index
    %c0_10 = arith.constant 0 : index
    %26 = vector.load %arg4[%c0_9, %c0_10] : memref<16x32xbf16, #tpu.memory_space<vmem>>, vector<16x32xbf16>
    tpu.vector_store %arg4[%c0_9, %c0_10], %25 {strides = array<i32>} : memref<16x32xbf16, #tpu.memory_space<vmem>>, vector<16x32xbf16>,
    return
  }
  func.func @transform_0(%arg0: i32) -> (i32, i32) {
    %c0_i32 = arith.constant 0 : i32
    %c0_i32_0 = arith.constant 0 : i32
    return %arg0, %c0_i32 : i32, i32
  }
  func.func @transform_1(%arg0: i32) -> (i32, i32) {
    %c0_i32 = arith.constant 0 : i32
    %c0_i32_0 = arith.constant 0 : i32
    %c0_i32_1 = arith.constant 0 : i32
    return %c0_i32, %c0_i32_0 : i32, i32
  }
  func.func @transform_2(%arg0: i32) -> (i32, i32) {
    %c0_i32 = arith.constant 0 : i32
    %c0_i32_0 = arith.constant 0 : i32
    %c0_i32_1 = arith.constant 0 : i32
    return %c0_i32, %c0_i32_0 : i32, i32
  }
  func.func @transform_3(%arg0: i32) -> (i32, i32) {
    %c0_i32 = arith.constant 0 : i32
    %c0_i32_0 = arith.constant 0 : i32
    return %arg0, %c0_i32 : i32, i32
  }
}

module attributes {stable_mosaic.version = 11 : i64} {
  func.func @_qkv_kernel(%arg0: i32, %arg1: i32, %arg2: memref<16x32xbf16, #tpu.memory_space<vmem>>, %arg3: memref<32x96xbf16, #tpu.memory_space<vmem>>, %arg4: memref<1x96xf32, #tpu.memory_space<vmem>>, %arg5: memref<16x32xbf16, #tpu.memory_space<vmem>>, %arg6: memref<16x32xbf16, #tpu.memory_space<vmem>>, %arg7: memref<16x32xbf16, #tpu.memory_space<vmem>>, %arg8: memref<16x96xf32, #tpu.memory_space<vmem>>) attributes {dimension_semantics = [#tpu.dimension_semantics<parallel>, #tpu.dimension_semantics<arbitrary>], iteration_bounds = array<i64: 1, 1>, scalar_prefetch = 0 : i64, scratch_operands = 1 : i64, tpu.core_type = #tpu.core_type<tc>, window_params = [{transform_indices = @transform_0, window_bounds = array<i64: 16, 32>}, {transform_indices = @transform_1, window_bounds = array<i64: 32, 96>}, {pipeline_mode = #tpu.pipeline_mode<synchronous>, transform_indices = @transform_2, window_bounds = array<i64: 1, 96>}, {transform_indices = @transform_3, window_bounds = array<i64: 16, 32>}, {transform_indices = @transform_4, window_bounds = array<i64: 16, 32>}, {transform_indices = @transform_5, window_bounds = array<i64: 16, 32>}]} {
    %c0_i32 = arith.constant 0 : i32
    %0 = arith.cmpi eq, %arg1, %c0_i32 : i32
    %1 = arith.extui %0 : i1 to i32
    %c0_i32_0 = arith.constant 0 : i32
    %2 = arith.cmpi ne, %1, %c0_i32_0 : i32
    scf.if %2 {
      %cst_10 = arith.constant 0.000000e+00 : f32
      %12 = vector.broadcast %cst_10 : f32 to vector<16x96xf32>
      %c0_11 = arith.constant 0 : index
      %c0_12 = arith.constant 0 : index
      %13 = vector.load %arg8[%c0_11, %c0_12] : memref<16x96xf32, #tpu.memory_space<vmem>>, vector<16x96xf32>
      tpu.vector_store %arg8[%c0_11, %c0_12], %12 {strides = array<i32>} : memref<16x96xf32, #tpu.memory_space<vmem>>, vector<16x96xf32>,
    } else {
    }
    %c0 = arith.constant 0 : index
    %c0_1 = arith.constant 0 : index
    %3 = vector.load %arg8[%c0, %c0_1] : memref<16x96xf32, #tpu.memory_space<vmem>>, vector<16x96xf32>
    %c0_2 = arith.constant 0 : index
    %c0_3 = arith.constant 0 : index
    %4 = vector.load %arg2[%c0_2, %c0_3] : memref<16x32xbf16, #tpu.memory_space<vmem>>, vector<16x32xbf16>
    %c0_4 = arith.constant 0 : index
    %c0_5 = arith.constant 0 : index
    %5 = vector.load %arg3[%c0_4, %c0_5] : memref<32x96xbf16, #tpu.memory_space<vmem>>, vector<32x96xbf16>
    %cst = arith.constant dense<0.000000e+00> : vector<16x96xf32>
    %6 = tpu.matmul %4, %5, %cst {dimension_numbers = #tpu.dot_dimension_numbers<[1], [0], [0], [1], [0, 0, 1, 1], [], []>} : vector<16x32xbf16>, vector<32x96xbf16>, vector<16x96xf32> -> vector<16x96xf32>
    %7 = arith.addf %3, %6 : vector<16x96xf32>
    %c0_6 = arith.constant 0 : index
    %c0_7 = arith.constant 0 : index
    %8 = vector.load %arg8[%c0_6, %c0_7] : memref<16x96xf32, #tpu.memory_space<vmem>>, vector<16x96xf32>
    tpu.vector_store %arg8[%c0_6, %c0_7], %7 {strides = array<i32>} : memref<16x96xf32, #tpu.memory_space<vmem>>, vector<16x96xf32>,
    %c0_i32_8 = arith.constant 0 : i32
    %9 = arith.cmpi eq, %arg1, %c0_i32_8 : i32
    %10 = arith.extui %9 : i1 to i32
    %c0_i32_9 = arith.constant 0 : i32
    %11 = arith.cmpi ne, %10, %c0_i32_9 : i32
    scf.if %11 {
      %c0_10 = arith.constant 0 : index
      %c0_11 = arith.constant 0 : index
      %12 = vector.load %arg8[%c0_10, %c0_11] : memref<16x96xf32, #tpu.memory_space<vmem>>, vector<16x96xf32>
      %c0_12 = arith.constant 0 : index
      %c0_13 = arith.constant 0 : index
      %13 = vector.load %arg4[%c0_12, %c0_13] : memref<1x96xf32, #tpu.memory_space<vmem>>, vector<1x96xf32>
      %14 = vector.broadcast %13 : vector<1x96xf32> to vector<16x96xf32>
      %15 = arith.addf %12, %14 : vector<16x96xf32>
      %16 = vector.extract_strided_slice %15 {offsets = [0, 0], sizes = [16, 32], strides = [1, 1]} : vector<16x96xf32> to vector<16x32xf32>
      %17 = arith.truncf %16 : vector<16x32xf32> to vector<16x32xbf16>
      %c0_14 = arith.constant 0 : index
      %c0_15 = arith.constant 0 : index
      %18 = vector.load %arg5[%c0_14, %c0_15] : memref<16x32xbf16, #tpu.memory_space<vmem>>, vector<16x32xbf16>
      tpu.vector_store %arg5[%c0_14, %c0_15], %17 {strides = array<i32>} : memref<16x32xbf16, #tpu.memory_space<vmem>>, vector<16x32xbf16>,
      %19 = vector.extract_strided_slice %15 {offsets = [0, 32], sizes = [16, 32], strides = [1, 1]} : vector<16x96xf32> to vector<16x32xf32>
      %20 = arith.truncf %19 : vector<16x32xf32> to vector<16x32xbf16>
      %c0_16 = arith.constant 0 : index
      %c0_17 = arith.constant 0 : index
      %21 = vector.load %arg6[%c0_16, %c0_17] : memref<16x32xbf16, #tpu.memory_space<vmem>>, vector<16x32xbf16>
      tpu.vector_store %arg6[%c0_16, %c0_17], %20 {strides = array<i32>} : memref<16x32xbf16, #tpu.memory_space<vmem>>, vector<16x32xbf16>,
      %22 = vector.extract_strided_slice %15 {offsets = [0, 64], sizes = [16, 32], strides = [1, 1]} : vector<16x96xf32> to vector<16x32xf32>
      %23 = arith.truncf %22 : vector<16x32xf32> to vector<16x32xbf16>
      %c0_18 = arith.constant 0 : index
      %c0_19 = arith.constant 0 : index
      %24 = vector.load %arg7[%c0_18, %c0_19] : memref<16x32xbf16, #tpu.memory_space<vmem>>, vector<16x32xbf16>
      tpu.vector_store %arg7[%c0_18, %c0_19], %23 {strides = array<i32>} : memref<16x32xbf16, #tpu.memory_space<vmem>>, vector<16x32xbf16>,
    } else {
    }
    return
  }
  func.func @transform_0(%arg0: i32, %arg1: i32) -> (i32, i32) {
    %c0_i32 = arith.constant 0 : i32
    return %arg0, %arg1 : i32, i32
  }
  func.func @transform_1(%arg0: i32, %arg1: i32) -> (i32, i32) {
    %c0_i32 = arith.constant 0 : i32
    %c0_i32_0 = arith.constant 0 : i32
    return %arg1, %c0_i32 : i32, i32
  }
  func.func @transform_2(%arg0: i32, %arg1: i32) -> (i32, i32) {
    %c0_i32 = arith.constant 0 : i32
    %c0_i32_0 = arith.constant 0 : i32
    %c0_i32_1 = arith.constant 0 : i32
    return %c0_i32, %c0_i32_0 : i32, i32
  }
  func.func @transform_3(%arg0: i32, %arg1: i32) -> (i32, i32) {
    %c0_i32 = arith.constant 0 : i32
    %c0_i32_0 = arith.constant 0 : i32
    return %arg0, %c0_i32 : i32, i32
  }
  func.func @transform_4(%arg0: i32, %arg1: i32) -> (i32, i32) {
    %c0_i32 = arith.constant 0 : i32
    %c0_i32_0 = arith.constant 0 : i32
    return %arg0, %c0_i32 : i32, i32
  }
  func.func @transform_5(%arg0: i32, %arg1: i32) -> (i32, i32) {
    %c0_i32 = arith.constant 0 : i32
    %c0_i32_0 = arith.constant 0 : i32
    return %arg0, %c0_i32 : i32, i32
  }
}

module attributes {stable_mosaic.version = 11 : i64} {
  func.func @_linear_res_ln_kernel(%arg0: i32, %arg1: i32, %arg2: memref<16x32xbf16, #tpu.memory_space<vmem>>, %arg3: memref<32x32xbf16, #tpu.memory_space<vmem>>, %arg4: memref<1x32xf32, #tpu.memory_space<vmem>>, %arg5: memref<16x32xbf16, #tpu.memory_space<vmem>>, %arg6: memref<1x32xf32, #tpu.memory_space<vmem>>, %arg7: memref<1x32xf32, #tpu.memory_space<vmem>>, %arg8: memref<16x32xbf16, #tpu.memory_space<vmem>>, %arg9: memref<16x32xf32, #tpu.memory_space<vmem>>) attributes {dimension_semantics = [#tpu.dimension_semantics<parallel>, #tpu.dimension_semantics<arbitrary>], iteration_bounds = array<i64: 1, 1>, scalar_prefetch = 0 : i64, scratch_operands = 1 : i64, tpu.core_type = #tpu.core_type<tc>, window_params = [{transform_indices = @transform_0, window_bounds = array<i64: 16, 32>}, {transform_indices = @transform_1, window_bounds = array<i64: 32, 32>}, {pipeline_mode = #tpu.pipeline_mode<synchronous>, transform_indices = @transform_2, window_bounds = array<i64: 1, 32>}, {transform_indices = @transform_3, window_bounds = array<i64: 16, 32>}, {pipeline_mode = #tpu.pipeline_mode<synchronous>, transform_indices = @transform_4, window_bounds = array<i64: 1, 32>}, {pipeline_mode = #tpu.pipeline_mode<synchronous>, transform_indices = @transform_5, window_bounds = array<i64: 1, 32>}, {transform_indices = @transform_6, window_bounds = array<i64: 16, 32>}]} {
    %c0_i32 = arith.constant 0 : i32
    %0 = arith.cmpi eq, %arg1, %c0_i32 : i32
    %1 = arith.extui %0 : i1 to i32
    %c0_i32_0 = arith.constant 0 : i32
    %2 = arith.cmpi ne, %1, %c0_i32_0 : i32
    scf.if %2 {
      %cst_10 = arith.constant 0.000000e+00 : f32
      %12 = vector.broadcast %cst_10 : f32 to vector<16x32xf32>
      %c0_11 = arith.constant 0 : index
      %c0_12 = arith.constant 0 : index
      %13 = vector.load %arg9[%c0_11, %c0_12] : memref<16x32xf32, #tpu.memory_space<vmem>>, vector<16x32xf32>
      tpu.vector_store %arg9[%c0_11, %c0_12], %12 {strides = array<i32>} : memref<16x32xf32, #tpu.memory_space<vmem>>, vector<16x32xf32>,
    } else {
    }
    %c0 = arith.constant 0 : index
    %c0_1 = arith.constant 0 : index
    %3 = vector.load %arg9[%c0, %c0_1] : memref<16x32xf32, #tpu.memory_space<vmem>>, vector<16x32xf32>
    %c0_2 = arith.constant 0 : index
    %c0_3 = arith.constant 0 : index
    %4 = vector.load %arg2[%c0_2, %c0_3] : memref<16x32xbf16, #tpu.memory_space<vmem>>, vector<16x32xbf16>
    %c0_4 = arith.constant 0 : index
    %c0_5 = arith.constant 0 : index
    %5 = vector.load %arg3[%c0_4, %c0_5] : memref<32x32xbf16, #tpu.memory_space<vmem>>, vector<32x32xbf16>
    %cst = arith.constant dense<0.000000e+00> : vector<16x32xf32>
    %6 = tpu.matmul %4, %5, %cst {dimension_numbers = #tpu.dot_dimension_numbers<[1], [0], [0], [1], [0, 0, 1, 1], [], []>} : vector<16x32xbf16>, vector<32x32xbf16>, vector<16x32xf32> -> vector<16x32xf32>
    %7 = arith.addf %3, %6 : vector<16x32xf32>
    %c0_6 = arith.constant 0 : index
    %c0_7 = arith.constant 0 : index
    %8 = vector.load %arg9[%c0_6, %c0_7] : memref<16x32xf32, #tpu.memory_space<vmem>>, vector<16x32xf32>
    tpu.vector_store %arg9[%c0_6, %c0_7], %7 {strides = array<i32>} : memref<16x32xf32, #tpu.memory_space<vmem>>, vector<16x32xf32>,
    %c0_i32_8 = arith.constant 0 : i32
    %9 = arith.cmpi eq, %arg1, %c0_i32_8 : i32
    %10 = arith.extui %9 : i1 to i32
    %c0_i32_9 = arith.constant 0 : i32
    %11 = arith.cmpi ne, %10, %c0_i32_9 : i32
    scf.if %11 {
      %c0_10 = arith.constant 0 : index
      %c0_11 = arith.constant 0 : index
      %12 = vector.load %arg9[%c0_10, %c0_11] : memref<16x32xf32, #tpu.memory_space<vmem>>, vector<16x32xf32>
      %c0_12 = arith.constant 0 : index
      %c0_13 = arith.constant 0 : index
      %13 = vector.load %arg4[%c0_12, %c0_13] : memref<1x32xf32, #tpu.memory_space<vmem>>, vector<1x32xf32>
      %14 = vector.broadcast %13 : vector<1x32xf32> to vector<16x32xf32>
      %15 = arith.addf %12, %14 : vector<16x32xf32>
      %c0_14 = arith.constant 0 : index
      %c0_15 = arith.constant 0 : index
      %16 = vector.load %arg5[%c0_14, %c0_15] : memref<16x32xbf16, #tpu.memory_space<vmem>>, vector<16x32xbf16>
      %17 = arith.extf %16 : vector<16x32xbf16> to vector<16x32xf32>
      %18 = arith.addf %15, %17 : vector<16x32xf32>
      %cst_16 = arith.constant dense<0.000000e+00> : vector<16xf32>
      %19 = vector.multi_reduction <add>, %18, %cst_16 [1] : vector<16x32xf32> to vector<16xf32>
      %20 = vector.shape_cast %19 : vector<16xf32> to vector<16x1xf32>
      %cst_17 = arith.constant 3.200000e+01 : f32
      %21 = vector.broadcast %cst_17 : f32 to vector<16x1xf32>
      %22 = arith.divf %20, %21 : vector<16x1xf32>
      %23 = vector.broadcast %22 : vector<16x1xf32> to vector<16x32xf32>
      %24 = arith.subf %18, %23 : vector<16x32xf32>
      %25 = arith.mulf %24, %24 : vector<16x32xf32>
      %cst_18 = arith.constant dense<0.000000e+00> : vector<16xf32>
      %26 = vector.multi_reduction <add>, %25, %cst_18 [1] : vector<16x32xf32> to vector<16xf32>
      %27 = vector.shape_cast %26 : vector<16xf32> to vector<16x1xf32>
      %cst_19 = arith.constant 3.200000e+01 : f32
      %28 = vector.broadcast %cst_19 : f32 to vector<16x1xf32>
      %29 = arith.divf %27, %28 : vector<16x1xf32>
      %30 = vector.broadcast %22 : vector<16x1xf32> to vector<16x32xf32>
      %31 = arith.subf %18, %30 : vector<16x32xf32>
      %cst_20 = arith.constant 9.99999974E-6 : f32
      %32 = vector.broadcast %cst_20 : f32 to vector<16x1xf32>
      %33 = arith.addf %29, %32 : vector<16x1xf32>
      %34 = math.rsqrt %33 : vector<16x1xf32>
      %35 = vector.broadcast %34 : vector<16x1xf32> to vector<16x32xf32>
      %36 = arith.mulf %31, %35 : vector<16x32xf32>
      %c0_21 = arith.constant 0 : index
      %c0_22 = arith.constant 0 : index
      %37 = vector.load %arg6[%c0_21, %c0_22] : memref<1x32xf32, #tpu.memory_space<vmem>>, vector<1x32xf32>
      %38 = vector.broadcast %37 : vector<1x32xf32> to vector<16x32xf32>
      %39 = arith.mulf %36, %38 : vector<16x32xf32>
      %c0_23 = arith.constant 0 : index
      %c0_24 = arith.constant 0 : index
      %40 = vector.load %arg7[%c0_23, %c0_24] : memref<1x32xf32, #tpu.memory_space<vmem>>, vector<1x32xf32>
      %41 = vector.broadcast %40 : vector<1x32xf32> to vector<16x32xf32>
      %42 = arith.addf %39, %41 : vector<16x32xf32>
      %43 = arith.truncf %42 : vector<16x32xf32> to vector<16x32xbf16>
      %c0_25 = arith.constant 0 : index
      %c0_26 = arith.constant 0 : index
      %44 = vector.load %arg8[%c0_25, %c0_26] : memref<16x32xbf16, #tpu.memory_space<vmem>>, vector<16x32xbf16>
      tpu.vector_store %arg8[%c0_25, %c0_26], %43 {strides = array<i32>} : memref<16x32xbf16, #tpu.memory_space<vmem>>, vector<16x32xbf16>,
    } else {
    }
    return
  }
  func.func @transform_0(%arg0: i32, %arg1: i32) -> (i32, i32) {
    %c0_i32 = arith.constant 0 : i32
    return %arg0, %arg1 : i32, i32
  }
  func.func @transform_1(%arg0: i32, %arg1: i32) -> (i32, i32) {
    %c0_i32 = arith.constant 0 : i32
    %c0_i32_0 = arith.constant 0 : i32
    return %arg1, %c0_i32 : i32, i32
  }
  func.func @transform_2(%arg0: i32, %arg1: i32) -> (i32, i32) {
    %c0_i32 = arith.constant 0 : i32
    %c0_i32_0 = arith.constant 0 : i32
    %c0_i32_1 = arith.constant 0 : i32
    return %c0_i32, %c0_i32_0 : i32, i32
  }
  func.func @transform_3(%arg0: i32, %arg1: i32) -> (i32, i32) {
    %c0_i32 = arith.constant 0 : i32
    %c0_i32_0 = arith.constant 0 : i32
    return %arg0, %c0_i32 : i32, i32
  }
  func.func @transform_4(%arg0: i32, %arg1: i32) -> (i32, i32) {
    %c0_i32 = arith.constant 0 : i32
    %c0_i32_0 = arith.constant 0 : i32
    %c0_i32_1 = arith.constant 0 : i32
    return %c0_i32, %c0_i32_0 : i32, i32
  }
  func.func @transform_5(%arg0: i32, %arg1: i32) -> (i32, i32) {
    %c0_i32 = arith.constant 0 : i32
    %c0_i32_0 = arith.constant 0 : i32
    %c0_i32_1 = arith.constant 0 : i32
    return %c0_i32, %c0_i32_0 : i32, i32
  }
  func.func @transform_6(%arg0: i32, %arg1: i32) -> (i32, i32) {
    %c0_i32 = arith.constant 0 : i32
    %c0_i32_0 = arith.constant 0 : i32
    return %arg0, %c0_i32 : i32, i32
  }
}

module attributes {stable_mosaic.version = 11 : i64} {
  func.func @_attention_kernel(%arg0: i32, %arg1: i32, %arg2: memref<1x8x32xbf16, #tpu.memory_space<vmem>>, %arg3: memref<1x8x32xbf16, #tpu.memory_space<vmem>>, %arg4: memref<1x8x32xbf16, #tpu.memory_space<vmem>>, %arg5: memref<1x1x8xf32, #tpu.memory_space<vmem>>, %arg6: memref<1x8x32xbf16, #tpu.memory_space<vmem>>) attributes {dimension_semantics = [#tpu.dimension_semantics<parallel>, #tpu.dimension_semantics<parallel>], iteration_bounds = array<i64: 2, 1>, scalar_prefetch = 0 : i64, scratch_operands = 0 : i64, tpu.core_type = #tpu.core_type<tc>, window_params = [{transform_indices = @transform_0, window_bounds = array<i64: 1, 8, 32>}, {transform_indices = @transform_1, window_bounds = array<i64: 1, 8, 32>}, {transform_indices = @transform_2, window_bounds = array<i64: 1, 8, 32>}, {transform_indices = @transform_3, window_bounds = array<i64: 1, 1, 8>}, {transform_indices = @transform_4, window_bounds = array<i64: 1, 8, 32>}]} {
    %c0 = arith.constant 0 : index
    %c0_0 = arith.constant 0 : index
    %c0_1 = arith.constant 0 : index
    %0 = vector.load %arg2[%c0, %c0_0, %c0_1] : memref<1x8x32xbf16, #tpu.memory_space<vmem>>, vector<1x8x32xbf16>
    %1 = vector.shape_cast %0 : vector<1x8x32xbf16> to vector<8x32xbf16>
    %c0_2 = arith.constant 0 : index
    %c0_3 = arith.constant 0 : index
    %c0_4 = arith.constant 0 : index
    %2 = vector.load %arg3[%c0_2, %c0_3, %c0_4] : memref<1x8x32xbf16, #tpu.memory_space<vmem>>, vector<1x8x32xbf16>
    %3 = vector.shape_cast %2 : vector<1x8x32xbf16> to vector<8x32xbf16>
    %c0_5 = arith.constant 0 : index
    %c0_6 = arith.constant 0 : index
    %c0_7 = arith.constant 0 : index
    %4 = vector.load %arg4[%c0_5, %c0_6, %c0_7] : memref<1x8x32xbf16, #tpu.memory_space<vmem>>, vector<1x8x32xbf16>
    %5 = vector.shape_cast %4 : vector<1x8x32xbf16> to vector<8x32xbf16>
    %c0_8 = arith.constant 0 : index
    %c0_9 = arith.constant 0 : index
    %c0_10 = arith.constant 0 : index
    %6 = vector.load %arg5[%c0_8, %c0_9, %c0_10] : memref<1x1x8xf32, #tpu.memory_space<vmem>>, vector<1x1x8xf32>
    %7 = vector.shape_cast %6 : vector<1x1x8xf32> to vector<1x8xf32>
    %cst = arith.constant 1.000000e+00 : f32
    %8 = vector.broadcast %cst : f32 to vector<1x8xf32>
    %9 = arith.subf %8, %7 : vector<1x8xf32>
    %cst_11 = arith.constant -1.000000e+09 : f32
    %10 = vector.broadcast %cst_11 : f32 to vector<1x8xf32>
    %11 = arith.mulf %9, %10 : vector<1x8xf32>
    %12 = tpu.transpose %3, [1, 0] : vector<8x32xbf16> -> vector<32x8xbf16>
    %13 = vector.extract_strided_slice %1 {offsets = [0, 0], sizes = [8, 8], strides = [1, 1]} : vector<8x32xbf16> to vector<8x8xbf16>
    %14 = arith.extf %13 : vector<8x8xbf16> to vector<8x8xf32>
    %cst_12 = arith.constant 0.353553385 : f32
    %15 = vector.broadcast %cst_12 : f32 to vector<8x8xf32>
    %16 = arith.mulf %14, %15 : vector<8x8xf32>
    %17 = arith.truncf %16 : vector<8x8xf32> to vector<8x8xbf16>
    %18 = vector.extract_strided_slice %12 {offsets = [0, 0], sizes = [8, 8], strides = [1, 1]} : vector<32x8xbf16> to vector<8x8xbf16>
    %cst_13 = arith.constant dense<0.000000e+00> : vector<8x8xf32>
    %19 = tpu.matmul %17, %18, %cst_13 {dimension_numbers = #tpu.dot_dimension_numbers<[1], [0], [0], [1], [0, 0, 1, 1], [], []>} : vector<8x8xbf16>, vector<8x8xbf16>, vector<8x8xf32> -> vector<8x8xf32>
    %20 = vector.broadcast %11 : vector<1x8xf32> to vector<8x8xf32>
    %21 = arith.addf %19, %20 : vector<8x8xf32>
    %cst_14 = arith.constant dense<0xFF800000> : vector<8xf32>
    %22 = vector.multi_reduction <maximumf>, %21, %cst_14 [1] : vector<8x8xf32> to vector<8xf32>
    %23 = vector.shape_cast %22 : vector<8xf32> to vector<8x1xf32>
    %24 = vector.broadcast %23 : vector<8x1xf32> to vector<8x8xf32>
    %25 = arith.subf %21, %24 : vector<8x8xf32>
    %26 = math.exp %25 : vector<8x8xf32>
    %cst_15 = arith.constant dense<0.000000e+00> : vector<8xf32>
    %27 = vector.multi_reduction <add>, %26, %cst_15 [1] : vector<8x8xf32> to vector<8xf32>
    %28 = vector.shape_cast %27 : vector<8xf32> to vector<8x1xf32>
    %29 = tpu.reciprocal %28 {approx = true} : vector<8x1xf32> -> vector<8x1xf32>
    %30 = vector.broadcast %29 : vector<8x1xf32> to vector<8x8xf32>
    %31 = arith.mulf %26, %30 : vector<8x8xf32>
    %32 = arith.truncf %31 : vector<8x8xf32> to vector<8x8xbf16>
    %33 = vector.extract_strided_slice %5 {offsets = [0, 0], sizes = [8, 8], strides = [1, 1]} : vector<8x32xbf16> to vector<8x8xbf16>
    %cst_16 = arith.constant dense<0.000000e+00> : vector<8x8xf32>
    %34 = tpu.matmul %32, %33, %cst_16 {dimension_numbers = #tpu.dot_dimension_numbers<[1], [0], [0], [1], [0, 0, 1, 1], [], []>} : vector<8x8xbf16>, vector<8x8xbf16>, vector<8x8xf32> -> vector<8x8xf32>
    %35 = vector.extract_strided_slice %1 {offsets = [0, 8], sizes = [8, 8], strides = [1, 1]} : vector<8x32xbf16> to vector<8x8xbf16>
    %36 = arith.extf %35 : vector<8x8xbf16> to vector<8x8xf32>
    %cst_17 = arith.constant 0.353553385 : f32
    %37 = vector.broadcast %cst_17 : f32 to vector<8x8xf32>
    %38 = arith.mulf %36, %37 : vector<8x8xf32>
    %39 = arith.truncf %38 : vector<8x8xf32> to vector<8x8xbf16>
    %40 = vector.extract_strided_slice %12 {offsets = [8, 0], sizes = [8, 8], strides = [1, 1]} : vector<32x8xbf16> to vector<8x8xbf16>
    %cst_18 = arith.constant dense<0.000000e+00> : vector<8x8xf32>
    %41 = tpu.matmul %39, %40, %cst_18 {dimension_numbers = #tpu.dot_dimension_numbers<[1], [0], [0], [1], [0, 0, 1, 1], [], []>} : vector<8x8xbf16>, vector<8x8xbf16>, vector<8x8xf32> -> vector<8x8xf32>
    %42 = vector.broadcast %11 : vector<1x8xf32> to vector<8x8xf32>
    %43 = arith.addf %41, %42 : vector<8x8xf32>
    %cst_19 = arith.constant dense<0xFF800000> : vector<8xf32>
    %44 = vector.multi_reduction <maximumf>, %43, %cst_19 [1] : vector<8x8xf32> to vector<8xf32>
    %45 = vector.shape_cast %44 : vector<8xf32> to vector<8x1xf32>
    %46 = vector.broadcast %45 : vector<8x1xf32> to vector<8x8xf32>
    %47 = arith.subf %43, %46 : vector<8x8xf32>
    %48 = math.exp %47 : vector<8x8xf32>
    %cst_20 = arith.constant dense<0.000000e+00> : vector<8xf32>
    %49 = vector.multi_reduction <add>, %48, %cst_20 [1] : vector<8x8xf32> to vector<8xf32>
    %50 = vector.shape_cast %49 : vector<8xf32> to vector<8x1xf32>
    %51 = tpu.reciprocal %50 {approx = true} : vector<8x1xf32> -> vector<8x1xf32>
    %52 = vector.broadcast %51 : vector<8x1xf32> to vector<8x8xf32>
    %53 = arith.mulf %48, %52 : vector<8x8xf32>
    %54 = arith.truncf %53 : vector<8x8xf32> to vector<8x8xbf16>
    %55 = vector.extract_strided_slice %5 {offsets = [0, 8], sizes = [8, 8], strides = [1, 1]} : vector<8x32xbf16> to vector<8x8xbf16>
    %cst_21 = arith.constant dense<0.000000e+00> : vector<8x8xf32>
    %56 = tpu.matmul %54, %55, %cst_21 {dimension_numbers = #tpu.dot_dimension_numbers<[1], [0], [0], [1], [0, 0, 1, 1], [], []>} : vector<8x8xbf16>, vector<8x8xbf16>, vector<8x8xf32> -> vector<8x8xf32>
    %57 = vector.extract_strided_slice %1 {offsets = [0, 16], sizes = [8, 8], strides = [1, 1]} : vector<8x32xbf16> to vector<8x8xbf16>
    %58 = arith.extf %57 : vector<8x8xbf16> to vector<8x8xf32>
    %cst_22 = arith.constant 0.353553385 : f32
    %59 = vector.broadcast %cst_22 : f32 to vector<8x8xf32>
    %60 = arith.mulf %58, %59 : vector<8x8xf32>
    %61 = arith.truncf %60 : vector<8x8xf32> to vector<8x8xbf16>
    %62 = vector.extract_strided_slice %12 {offsets = [16, 0], sizes = [8, 8], strides = [1, 1]} : vector<32x8xbf16> to vector<8x8xbf16>
    %cst_23 = arith.constant dense<0.000000e+00> : vector<8x8xf32>
    %63 = tpu.matmul %61, %62, %cst_23 {dimension_numbers = #tpu.dot_dimension_numbers<[1], [0], [0], [1], [0, 0, 1, 1], [], []>} : vector<8x8xbf16>, vector<8x8xbf16>, vector<8x8xf32> -> vector<8x8xf32>
    %64 = vector.broadcast %11 : vector<1x8xf32> to vector<8x8xf32>
    %65 = arith.addf %63, %64 : vector<8x8xf32>
    %cst_24 = arith.constant dense<0xFF800000> : vector<8xf32>
    %66 = vector.multi_reduction <maximumf>, %65, %cst_24 [1] : vector<8x8xf32> to vector<8xf32>
    %67 = vector.shape_cast %66 : vector<8xf32> to vector<8x1xf32>
    %68 = vector.broadcast %67 : vector<8x1xf32> to vector<8x8xf32>
    %69 = arith.subf %65, %68 : vector<8x8xf32>
    %70 = math.exp %69 : vector<8x8xf32>
    %cst_25 = arith.constant dense<0.000000e+00> : vector<8xf32>
    %71 = vector.multi_reduction <add>, %70, %cst_25 [1] : vector<8x8xf32> to vector<8xf32>
    %72 = vector.shape_cast %71 : vector<8xf32> to vector<8x1xf32>
    %73 = tpu.reciprocal %72 {approx = true} : vector<8x1xf32> -> vector<8x1xf32>
    %74 = vector.broadcast %73 : vector<8x1xf32> to vector<8x8xf32>
    %75 = arith.mulf %70, %74 : vector<8x8xf32>
    %76 = arith.truncf %75 : vector<8x8xf32> to vector<8x8xbf16>
    %77 = vector.extract_strided_slice %5 {offsets = [0, 16], sizes = [8, 8], strides = [1, 1]} : vector<8x32xbf16> to vector<8x8xbf16>
    %cst_26 = arith.constant dense<0.000000e+00> : vector<8x8xf32>
    %78 = tpu.matmul %76, %77, %cst_26 {dimension_numbers = #tpu.dot_dimension_numbers<[1], [0], [0], [1], [0, 0, 1, 1], [], []>} : vector<8x8xbf16>, vector<8x8xbf16>, vector<8x8xf32> -> vector<8x8xf32>
    %79 = vector.extract_strided_slice %1 {offsets = [0, 24], sizes = [8, 8], strides = [1, 1]} : vector<8x32xbf16> to vector<8x8xbf16>
    %80 = arith.extf %79 : vector<8x8xbf16> to vector<8x8xf32>
    %cst_27 = arith.constant 0.353553385 : f32
    %81 = vector.broadcast %cst_27 : f32 to vector<8x8xf32>
    %82 = arith.mulf %80, %81 : vector<8x8xf32>
    %83 = arith.truncf %82 : vector<8x8xf32> to vector<8x8xbf16>
    %84 = vector.extract_strided_slice %12 {offsets = [24, 0], sizes = [8, 8], strides = [1, 1]} : vector<32x8xbf16> to vector<8x8xbf16>
    %cst_28 = arith.constant dense<0.000000e+00> : vector<8x8xf32>
    %85 = tpu.matmul %83, %84, %cst_28 {dimension_numbers = #tpu.dot_dimension_numbers<[1], [0], [0], [1], [0, 0, 1, 1], [], []>} : vector<8x8xbf16>, vector<8x8xbf16>, vector<8x8xf32> -> vector<8x8xf32>
    %86 = vector.broadcast %11 : vector<1x8xf32> to vector<8x8xf32>
    %87 = arith.addf %85, %86 : vector<8x8xf32>
    %cst_29 = arith.constant dense<0xFF800000> : vector<8xf32>
    %88 = vector.multi_reduction <maximumf>, %87, %cst_29 [1] : vector<8x8xf32> to vector<8xf32>
    %89 = vector.shape_cast %88 : vector<8xf32> to vector<8x1xf32>
    %90 = vector.broadcast %89 : vector<8x1xf32> to vector<8x8xf32>
    %91 = arith.subf %87, %90 : vector<8x8xf32>
    %92 = math.exp %91 : vector<8x8xf32>
    %cst_30 = arith.constant dense<0.000000e+00> : vector<8xf32>
    %93 = vector.multi_reduction <add>, %92, %cst_30 [1] : vector<8x8xf32> to vector<8xf32>
    %94 = vector.shape_cast %93 : vector<8xf32> to vector<8x1xf32>
    %95 = tpu.reciprocal %94 {approx = true} : vector<8x1xf32> -> vector<8x1xf32>
    %96 = vector.broadcast %95 : vector<8x1xf32> to vector<8x8xf32>
    %97 = arith.mulf %92, %96 : vector<8x8xf32>
    %98 = arith.truncf %97 : vector<8x8xf32> to vector<8x8xbf16>
    %99 = vector.extract_strided_slice %5 {offsets = [0, 24], sizes = [8, 8], strides = [1, 1]} : vector<8x32xbf16> to vector<8x8xbf16>
    %cst_31 = arith.constant dense<0.000000e+00> : vector<8x8xf32>
    %100 = tpu.matmul %98, %99, %cst_31 {dimension_numbers = #tpu.dot_dimension_numbers<[1], [0], [0], [1], [0, 0, 1, 1], [], []>} : vector<8x8xbf16>, vector<8x8xbf16>, vector<8x8xf32> -> vector<8x8xf32>
    %101 = tpu.concatenate %34, %56, %78, %100 in 1 : vector<8x8xf32>, vector<8x8xf32>, vector<8x8xf32>, vector<8x8xf32> -> vector<8x32xf32>
    %102 = arith.truncf %101 : vector<8x32xf32> to vector<8x32xbf16>
    %c0_32 = arith.constant 0 : index
    %c0_33 = arith.constant 0 : index
    %c0_34 = arith.constant 0 : index
    %103 = vector.load %arg6[%c0_32, %c0_33, %c0_34] : memref<1x8x32xbf16, #tpu.memory_space<vmem>>, vector<1x8x32xbf16>
    %104 = vector.shape_cast %103 : vector<1x8x32xbf16> to vector<8x32xbf16>
    %105 = vector.shape_cast %102 : vector<8x32xbf16> to vector<1x8x32xbf16>
    tpu.vector_store %arg6[%c0_32, %c0_33, %c0_34], %105 {strides = array<i32>} : memref<1x8x32xbf16, #tpu.memory_space<vmem>>, vector<1x8x32xbf16>,
    return
  }
  func.func @transform_0(%arg0: i32, %arg1: i32) -> (i32, i32, i32) {
    %c0_i32 = arith.constant 0 : i32
    %c0_i32_0 = arith.constant 0 : i32
    return %arg0, %c0_i32, %arg1 : i32, i32, i32
  }
  func.func @transform_1(%arg0: i32, %arg1: i32) -> (i32, i32, i32) {
    %c0_i32 = arith.constant 0 : i32
    %c0_i32_0 = arith.constant 0 : i32
    return %arg0, %c0_i32, %arg1 : i32, i32, i32
  }
  func.func @transform_2(%arg0: i32, %arg1: i32) -> (i32, i32, i32) {
    %c0_i32 = arith.constant 0 : i32
    %c0_i32_0 = arith.constant 0 : i32
    return %arg0, %c0_i32, %arg1 : i32, i32, i32
  }
  func.func @transform_3(%arg0: i32, %arg1: i32) -> (i32, i32, i32) {
    %c0_i32 = arith.constant 0 : i32
    %c0_i32_0 = arith.constant 0 : i32
    %c0_i32_1 = arith.constant 0 : i32
    return %arg0, %c0_i32, %c0_i32_0 : i32, i32, i32
  }
  func.func @transform_4(%arg0: i32, %arg1: i32) -> (i32, i32, i32) {
    %c0_i32 = arith.constant 0 : i32
    %c0_i32_0 = arith.constant 0 : i32
    return %arg0, %c0_i32, %arg1 : i32, i32, i32
  }
}

module attributes {stable_mosaic.version = 11 : i64} {
  func.func @_linear_kernel(%arg0: i32, %arg1: i32, %arg2: i32, %arg3: memref<16x32xbf16, #tpu.memory_space<vmem>>, %arg4: memref<32x64xbf16, #tpu.memory_space<vmem>>, %arg5: memref<1x64xf32, #tpu.memory_space<vmem>>, %arg6: memref<16x64xbf16, #tpu.memory_space<vmem>>, %arg7: memref<16x64xf32, #tpu.memory_space<vmem>>) attributes {dimension_semantics = [#tpu.dimension_semantics<parallel>, #tpu.dimension_semantics<parallel>, #tpu.dimension_semantics<arbitrary>], iteration_bounds = array<i64: 1, 1, 1>, scalar_prefetch = 0 : i64, scratch_operands = 1 : i64, tpu.core_type = #tpu.core_type<tc>, window_params = [{transform_indices = @transform_0, window_bounds = array<i64: 16, 32>}, {transform_indices = @transform_1, window_bounds = array<i64: 32, 64>}, {transform_indices = @transform_2, window_bounds = array<i64: 1, 64>}, {transform_indices = @transform_3, window_bounds = array<i64: 16, 64>}]} {
    %c0_i32 = arith.constant 0 : i32
    %0 = arith.cmpi eq, %arg2, %c0_i32 : i32
    %1 = arith.extui %0 : i1 to i32
    %c0_i32_0 = arith.constant 0 : i32
    %2 = arith.cmpi ne, %1, %c0_i32_0 : i32
    scf.if %2 {
      %cst_10 = arith.constant 0.000000e+00 : f32
      %12 = vector.broadcast %cst_10 : f32 to vector<16x64xf32>
      %c0_11 = arith.constant 0 : index
      %c0_12 = arith.constant 0 : index
      %13 = vector.load %arg7[%c0_11, %c0_12] : memref<16x64xf32, #tpu.memory_space<vmem>>, vector<16x64xf32>
      tpu.vector_store %arg7[%c0_11, %c0_12], %12 {strides = array<i32>} : memref<16x64xf32, #tpu.memory_space<vmem>>, vector<16x64xf32>,
    } else {
    }
    %c0 = arith.constant 0 : index
    %c0_1 = arith.constant 0 : index
    %3 = vector.load %arg7[%c0, %c0_1] : memref<16x64xf32, #tpu.memory_space<vmem>>, vector<16x64xf32>
    %c0_2 = arith.constant 0 : index
    %c0_3 = arith.constant 0 : index
    %4 = vector.load %arg3[%c0_2, %c0_3] : memref<16x32xbf16, #tpu.memory_space<vmem>>, vector<16x32xbf16>
    %c0_4 = arith.constant 0 : index
    %c0_5 = arith.constant 0 : index
    %5 = vector.load %arg4[%c0_4, %c0_5] : memref<32x64xbf16, #tpu.memory_space<vmem>>, vector<32x64xbf16>
    %cst = arith.constant dense<0.000000e+00> : vector<16x64xf32>
    %6 = tpu.matmul %4, %5, %cst {dimension_numbers = #tpu.dot_dimension_numbers<[1], [0], [0], [1], [0, 0, 1, 1], [], []>} : vector<16x32xbf16>, vector<32x64xbf16>, vector<16x64xf32> -> vector<16x64xf32>
    %7 = arith.addf %3, %6 : vector<16x64xf32>
    %c0_6 = arith.constant 0 : index
    %c0_7 = arith.constant 0 : index
    %8 = vector.load %arg7[%c0_6, %c0_7] : memref<16x64xf32, #tpu.memory_space<vmem>>, vector<16x64xf32>
    tpu.vector_store %arg7[%c0_6, %c0_7], %7 {strides = array<i32>} : memref<16x64xf32, #tpu.memory_space<vmem>>, vector<16x64xf32>,
    %c0_i32_8 = arith.constant 0 : i32
    %9 = arith.cmpi eq, %arg2, %c0_i32_8 : i32
    %10 = arith.extui %9 : i1 to i32
    %c0_i32_9 = arith.constant 0 : i32
    %11 = arith.cmpi ne, %10, %c0_i32_9 : i32
    scf.if %11 {
      %c0_10 = arith.constant 0 : index
      %c0_11 = arith.constant 0 : index
      %12 = vector.load %arg7[%c0_10, %c0_11] : memref<16x64xf32, #tpu.memory_space<vmem>>, vector<16x64xf32>
      %c0_12 = arith.constant 0 : index
      %c0_13 = arith.constant 0 : index
      %13 = vector.load %arg5[%c0_12, %c0_13] : memref<1x64xf32, #tpu.memory_space<vmem>>, vector<1x64xf32>
      %14 = vector.broadcast %13 : vector<1x64xf32> to vector<16x64xf32>
      %15 = arith.addf %12, %14 : vector<16x64xf32>
      %16 = arith.mulf %15, %15 : vector<16x64xf32>
      %17 = arith.mulf %15, %16 : vector<16x64xf32>
      %cst_14 = arith.constant 4.471500e-02 : f32
      %18 = vector.broadcast %cst_14 : f32 to vector<16x64xf32>
      %19 = arith.mulf %18, %17 : vector<16x64xf32>
      %20 = arith.addf %15, %19 : vector<16x64xf32>
      %cst_15 = arith.constant 0.797884583 : f32
      %21 = vector.broadcast %cst_15 : f32 to vector<16x64xf32>
      %22 = arith.mulf %21, %20 : vector<16x64xf32>
      %23 = math.tanh %22 : vector<16x64xf32>
      %cst_16 = arith.constant 1.000000e+00 : f32
      %24 = vector.broadcast %cst_16 : f32 to vector<16x64xf32>
      %25 = arith.addf %24, %23 : vector<16x64xf32>
      %cst_17 = arith.constant 5.000000e-01 : f32
      %26 = vector.broadcast %cst_17 : f32 to vector<16x64xf32>
      %27 = arith.mulf %26, %25 : vector<16x64xf32>
      %28 = arith.mulf %15, %27 : vector<16x64xf32>
      %29 = arith.truncf %28 : vector<16x64xf32> to vector<16x64xbf16>
      %c0_18 = arith.constant 0 : index
      %c0_19 = arith.constant 0 : index
      %30 = vector.load %arg6[%c0_18, %c0_19] : memref<16x64xbf16, #tpu.memory_space<vmem>>, vector<16x64xbf16>
      tpu.vector_store %arg6[%c0_18, %c0_19], %29 {strides = array<i32>} : memref<16x64xbf16, #tpu.memory_space<vmem>>, vector<16x64xbf16>,
    } else {
    }
    return
  }
  func.func @transform_0(%arg0: i32, %arg1: i32, %arg2: i32) -> (i32, i32) {
    %c0_i32 = arith.constant 0 : i32
    return %arg0, %arg2 : i32, i32
  }
  func.func @transform_1(%arg0: i32, %arg1: i32, %arg2: i32) -> (i32, i32) {
    %c0_i32 = arith.constant 0 : i32
    return %arg2, %arg1 : i32, i32
  }
  func.func @transform_2(%arg0: i32, %arg1: i32, %arg2: i32) -> (i32, i32) {
    %c0_i32 = arith.constant 0 : i32
    %c0_i32_0 = arith.constant 0 : i32
    return %c0_i32, %arg1 : i32, i32
  }
  func.func @transform_3(%arg0: i32, %arg1: i32, %arg2: i32) -> (i32, i32) {
    %c0_i32 = arith.constant 0 : i32
    return %arg0, %arg1 : i32, i32
  }
}

module attributes {stable_mosaic.version = 11 : i64} {
  func.func @_linear_res_ln_kernel(%arg0: i32, %arg1: i32, %arg2: memref<16x64xbf16, #tpu.memory_space<vmem>>, %arg3: memref<64x32xbf16, #tpu.memory_space<vmem>>, %arg4: memref<1x32xf32, #tpu.memory_space<vmem>>, %arg5: memref<16x32xbf16, #tpu.memory_space<vmem>>, %arg6: memref<1x32xf32, #tpu.memory_space<vmem>>, %arg7: memref<1x32xf32, #tpu.memory_space<vmem>>, %arg8: memref<16x32xbf16, #tpu.memory_space<vmem>>, %arg9: memref<16x32xf32, #tpu.memory_space<vmem>>) attributes {dimension_semantics = [#tpu.dimension_semantics<parallel>, #tpu.dimension_semantics<arbitrary>], iteration_bounds = array<i64: 1, 1>, scalar_prefetch = 0 : i64, scratch_operands = 1 : i64, tpu.core_type = #tpu.core_type<tc>, window_params = [{transform_indices = @transform_0, window_bounds = array<i64: 16, 64>}, {transform_indices = @transform_1, window_bounds = array<i64: 64, 32>}, {pipeline_mode = #tpu.pipeline_mode<synchronous>, transform_indices = @transform_2, window_bounds = array<i64: 1, 32>}, {transform_indices = @transform_3, window_bounds = array<i64: 16, 32>}, {pipeline_mode = #tpu.pipeline_mode<synchronous>, transform_indices = @transform_4, window_bounds = array<i64: 1, 32>}, {pipeline_mode = #tpu.pipeline_mode<synchronous>, transform_indices = @transform_5, window_bounds = array<i64: 1, 32>}, {transform_indices = @transform_6, window_bounds = array<i64: 16, 32>}]} {
    %c0_i32 = arith.constant 0 : i32
    %0 = arith.cmpi eq, %arg1, %c0_i32 : i32
    %1 = arith.extui %0 : i1 to i32
    %c0_i32_0 = arith.constant 0 : i32
    %2 = arith.cmpi ne, %1, %c0_i32_0 : i32
    scf.if %2 {
      %cst_10 = arith.constant 0.000000e+00 : f32
      %12 = vector.broadcast %cst_10 : f32 to vector<16x32xf32>
      %c0_11 = arith.constant 0 : index
      %c0_12 = arith.constant 0 : index
      %13 = vector.load %arg9[%c0_11, %c0_12] : memref<16x32xf32, #tpu.memory_space<vmem>>, vector<16x32xf32>
      tpu.vector_store %arg9[%c0_11, %c0_12], %12 {strides = array<i32>} : memref<16x32xf32, #tpu.memory_space<vmem>>, vector<16x32xf32>,
    } else {
    }
    %c0 = arith.constant 0 : index
    %c0_1 = arith.constant 0 : index
    %3 = vector.load %arg9[%c0, %c0_1] : memref<16x32xf32, #tpu.memory_space<vmem>>, vector<16x32xf32>
    %c0_2 = arith.constant 0 : index
    %c0_3 = arith.constant 0 : index
    %4 = vector.load %arg2[%c0_2, %c0_3] : memref<16x64xbf16, #tpu.memory_space<vmem>>, vector<16x64xbf16>
    %c0_4 = arith.constant 0 : index
    %c0_5 = arith.constant 0 : index
    %5 = vector.load %arg3[%c0_4, %c0_5] : memref<64x32xbf16, #tpu.memory_space<vmem>>, vector<64x32xbf16>
    %cst = arith.constant dense<0.000000e+00> : vector<16x32xf32>
    %6 = tpu.matmul %4, %5, %cst {dimension_numbers = #tpu.dot_dimension_numbers<[1], [0], [0], [1], [0, 0, 1, 1], [], []>} : vector<16x64xbf16>, vector<64x32xbf16>, vector<16x32xf32> -> vector<16x32xf32>
    %7 = arith.addf %3, %6 : vector<16x32xf32>
    %c0_6 = arith.constant 0 : index
    %c0_7 = arith.constant 0 : index
    %8 = vector.load %arg9[%c0_6, %c0_7] : memref<16x32xf32, #tpu.memory_space<vmem>>, vector<16x32xf32>
    tpu.vector_store %arg9[%c0_6, %c0_7], %7 {strides = array<i32>} : memref<16x32xf32, #tpu.memory_space<vmem>>, vector<16x32xf32>,
    %c0_i32_8 = arith.constant 0 : i32
    %9 = arith.cmpi eq, %arg1, %c0_i32_8 : i32
    %10 = arith.extui %9 : i1 to i32
    %c0_i32_9 = arith.constant 0 : i32
    %11 = arith.cmpi ne, %10, %c0_i32_9 : i32
    scf.if %11 {
      %c0_10 = arith.constant 0 : index
      %c0_11 = arith.constant 0 : index
      %12 = vector.load %arg9[%c0_10, %c0_11] : memref<16x32xf32, #tpu.memory_space<vmem>>, vector<16x32xf32>
      %c0_12 = arith.constant 0 : index
      %c0_13 = arith.constant 0 : index
      %13 = vector.load %arg4[%c0_12, %c0_13] : memref<1x32xf32, #tpu.memory_space<vmem>>, vector<1x32xf32>
      %14 = vector.broadcast %13 : vector<1x32xf32> to vector<16x32xf32>
      %15 = arith.addf %12, %14 : vector<16x32xf32>
      %c0_14 = arith.constant 0 : index
      %c0_15 = arith.constant 0 : index
      %16 = vector.load %arg5[%c0_14, %c0_15] : memref<16x32xbf16, #tpu.memory_space<vmem>>, vector<16x32xbf16>
      %17 = arith.extf %16 : vector<16x32xbf16> to vector<16x32xf32>
      %18 = arith.addf %15, %17 : vector<16x32xf32>
      %cst_16 = arith.constant dense<0.000000e+00> : vector<16xf32>
      %19 = vector.multi_reduction <add>, %18, %cst_16 [1] : vector<16x32xf32> to vector<16xf32>
      %20 = vector.shape_cast %19 : vector<16xf32> to vector<16x1xf32>
      %cst_17 = arith.constant 3.200000e+01 : f32
      %21 = vector.broadcast %cst_17 : f32 to vector<16x1xf32>
      %22 = arith.divf %20, %21 : vector<16x1xf32>
      %23 = vector.broadcast %22 : vector<16x1xf32> to vector<16x32xf32>
      %24 = arith.subf %18, %23 : vector<16x32xf32>
      %25 = arith.mulf %24, %24 : vector<16x32xf32>
      %cst_18 = arith.constant dense<0.000000e+00> : vector<16xf32>
      %26 = vector.multi_reduction <add>, %25, %cst_18 [1] : vector<16x32xf32> to vector<16xf32>
      %27 = vector.shape_cast %26 : vector<16xf32> to vector<16x1xf32>
      %cst_19 = arith.constant 3.200000e+01 : f32
      %28 = vector.broadcast %cst_19 : f32 to vector<16x1xf32>
      %29 = arith.divf %27, %28 : vector<16x1xf32>
      %30 = vector.broadcast %22 : vector<16x1xf32> to vector<16x32xf32>
      %31 = arith.subf %18, %30 : vector<16x32xf32>
      %cst_20 = arith.constant 9.99999974E-6 : f32
      %32 = vector.broadcast %cst_20 : f32 to vector<16x1xf32>
      %33 = arith.addf %29, %32 : vector<16x1xf32>
      %34 = math.rsqrt %33 : vector<16x1xf32>
      %35 = vector.broadcast %34 : vector<16x1xf32> to vector<16x32xf32>
      %36 = arith.mulf %31, %35 : vector<16x32xf32>
      %c0_21 = arith.constant 0 : index
      %c0_22 = arith.constant 0 : index
      %37 = vector.load %arg6[%c0_21, %c0_22] : memref<1x32xf32, #tpu.memory_space<vmem>>, vector<1x32xf32>
      %38 = vector.broadcast %37 : vector<1x32xf32> to vector<16x32xf32>
      %39 = arith.mulf %36, %38 : vector<16x32xf32>
      %c0_23 = arith.constant 0 : index
      %c0_24 = arith.constant 0 : index
      %40 = vector.load %arg7[%c0_23, %c0_24] : memref<1x32xf32, #tpu.memory_space<vmem>>, vector<1x32xf32>
      %41 = vector.broadcast %40 : vector<1x32xf32> to vector<16x32xf32>
      %42 = arith.addf %39, %41 : vector<16x32xf32>
      %43 = arith.truncf %42 : vector<16x32xf32> to vector<16x32xbf16>
      %c0_25 = arith.constant 0 : index
      %c0_26 = arith.constant 0 : index
      %44 = vector.load %arg8[%c0_25, %c0_26] : memref<16x32xbf16, #tpu.memory_space<vmem>>, vector<16x32xbf16>
      tpu.vector_store %arg8[%c0_25, %c0_26], %43 {strides = array<i32>} : memref<16x32xbf16, #tpu.memory_space<vmem>>, vector<16x32xbf16>,
    } else {
    }
    return
  }
  func.func @transform_0(%arg0: i32, %arg1: i32) -> (i32, i32) {
    %c0_i32 = arith.constant 0 : i32
    return %arg0, %arg1 : i32, i32
  }
  func.func @transform_1(%arg0: i32, %arg1: i32) -> (i32, i32) {
    %c0_i32 = arith.constant 0 : i32
    %c0_i32_0 = arith.constant 0 : i32
    return %arg1, %c0_i32 : i32, i32
  }
  func.func @transform_2(%arg0: i32, %arg1: i32) -> (i32, i32) {
    %c0_i32 = arith.constant 0 : i32
    %c0_i32_0 = arith.constant 0 : i32
    %c0_i32_1 = arith.constant 0 : i32
    return %c0_i32, %c0_i32_0 : i32, i32
  }
  func.func @transform_3(%arg0: i32, %arg1: i32) -> (i32, i32) {
    %c0_i32 = arith.constant 0 : i32
    %c0_i32_0 = arith.constant 0 : i32
    return %arg0, %c0_i32 : i32, i32
  }
  func.func @transform_4(%arg0: i32, %arg1: i32) -> (i32, i32) {
    %c0_i32 = arith.constant 0 : i32
    %c0_i32_0 = arith.constant 0 : i32
    %c0_i32_1 = arith.constant 0 : i32
    return %c0_i32, %c0_i32_0 : i32, i32
  }
  func.func @transform_5(%arg0: i32, %arg1: i32) -> (i32, i32) {
    %c0_i32 = arith.constant 0 : i32
    %c0_i32_0 = arith.constant 0 : i32
    %c0_i32_1 = arith.constant 0 : i32
    return %c0_i32, %c0_i32_0 : i32, i32
  }
  func.func @transform_6(%arg0: i32, %arg1: i32) -> (i32, i32) {
    %c0_i32 = arith.constant 0 : i32
    %c0_i32_0 = arith.constant 0 : i32
    return %arg0, %c0_i32 : i32, i32
  }
}

module attributes {stable_mosaic.version = 11 : i64} {
  func.func @_masked_mean_kernel(%arg0: i32, %arg1: memref<1x8x32xbf16, #tpu.memory_space<vmem>>, %arg2: memref<1x8x1xf32, #tpu.memory_space<vmem>>, %arg3: memref<1x1x32xf32, #tpu.memory_space<vmem>>) attributes {dimension_semantics = [#tpu.dimension_semantics<parallel>], iteration_bounds = array<i64: 2>, scalar_prefetch = 0 : i64, scratch_operands = 0 : i64, tpu.core_type = #tpu.core_type<tc>, window_params = [{transform_indices = @transform_0, window_bounds = array<i64: 1, 8, 32>}, {transform_indices = @transform_1, window_bounds = array<i64: 1, 8, 1>}, {transform_indices = @transform_2, window_bounds = array<i64: 1, 1, 32>}]} {
    %c0 = arith.constant 0 : index
    %c0_0 = arith.constant 0 : index
    %c0_1 = arith.constant 0 : index
    %0 = vector.load %arg1[%c0, %c0_0, %c0_1] : memref<1x8x32xbf16, #tpu.memory_space<vmem>>, vector<1x8x32xbf16>
    %1 = arith.extf %0 : vector<1x8x32xbf16> to vector<1x8x32xf32>
    %c0_2 = arith.constant 0 : index
    %c0_3 = arith.constant 0 : index
    %c0_4 = arith.constant 0 : index
    %2 = vector.load %arg2[%c0_2, %c0_3, %c0_4] : memref<1x8x1xf32, #tpu.memory_space<vmem>>, vector<1x8x1xf32>
    %3 = vector.broadcast %2 : vector<1x8x1xf32> to vector<1x8x32xf32>
    %4 = arith.mulf %1, %3 : vector<1x8x32xf32>
    %cst = arith.constant dense<0.000000e+00> : vector<1x32xf32>
    %5 = vector.multi_reduction <add>, %4, %cst [1] : vector<1x8x32xf32> to vector<1x32xf32>
    %6 = vector.shape_cast %5 : vector<1x32xf32> to vector<1x1x32xf32>
    %cst_5 = arith.constant 1.250000e-01 : f32
    %7 = vector.broadcast %cst_5 : f32 to vector<1x1x32xf32>
    %8 = arith.mulf %6, %7 : vector<1x1x32xf32>
    %c0_6 = arith.constant 0 : index
    %c0_7 = arith.constant 0 : index
    %c0_8 = arith.constant 0 : index
    %9 = vector.load %arg3[%c0_6, %c0_7, %c0_8] : memref<1x1x32xf32, #tpu.memory_space<vmem>>, vector<1x1x32xf32>
    tpu.vector_store %arg3[%c0_6, %c0_7, %c0_8], %8 {strides = array<i32>} : memref<1x1x32xf32, #tpu.memory_space<vmem>>, vector<1x1x32xf32>,
    return
  }
  func.func @transform_0(%arg0: i32) -> (i32, i32, i32) {
    %c0_i32 = arith.constant 0 : i32
    %c0_i32_0 = arith.constant 0 : i32
    %c0_i32_1 = arith.constant 0 : i32
    return %arg0, %c0_i32, %c0_i32_0 : i32, i32, i32
  }
  func.func @transform_1(%arg0: i32) -> (i32, i32, i32) {
    %c0_i32 = arith.constant 0 : i32
    %c0_i32_0 = arith.constant 0 : i32
    %c0_i32_1 = arith.constant 0 : i32
    return %arg0, %c0_i32, %c0_i32_0 : i32, i32, i32
  }
  func.func @transform_2(%arg0: i32) -> (i32, i32, i32) {
    %c0_i32 = arith.constant 0 : i32
    %c0_i32_0 = arith.constant 0 : i32
    %c0_i32_1 = arith.constant 0 : i32
    return %arg0, %c0_i32, %c0_i32_0 : i32, i32, i32
  }
}

module attributes {stable_mosaic.version = 11 : i64} {
  func.func @_mlp_mse_kernel(%arg0: memref<2x64xf32, #tpu.memory_space<vmem>>, %arg1: memref<2x8xf32, #tpu.memory_space<vmem>>, %arg2: memref<64x64xbf16, #tpu.memory_space<vmem>>, %arg3: memref<1x64xf32, #tpu.memory_space<vmem>>, %arg4: memref<64x64xbf16, #tpu.memory_space<vmem>>, %arg5: memref<1x64xf32, #tpu.memory_space<vmem>>, %arg6: memref<64x8xbf16, #tpu.memory_space<vmem>>, %arg7: memref<1x8xf32, #tpu.memory_space<vmem>>, %arg8: memref<2x8xf32, #tpu.memory_space<vmem>>, %arg9: memref<1x1xf32, #tpu.memory_space<vmem>>) attributes {dimension_semantics = [], scalar_prefetch = 0 : i64, scratch_operands = 0 : i64, tpu.core_type = #tpu.core_type<tc>} {
    %c0 = arith.constant 0 : index
    %c0_0 = arith.constant 0 : index
    %0 = vector.load %arg0[%c0, %c0_0] : memref<2x64xf32, #tpu.memory_space<vmem>>, vector<2x64xf32>
    %c0_1 = arith.constant 0 : index
    %c0_2 = arith.constant 0 : index
    %1 = vector.load %arg2[%c0_1, %c0_2] : memref<64x64xbf16, #tpu.memory_space<vmem>>, vector<64x64xbf16>
    %c0_3 = arith.constant 0 : index
    %c0_4 = arith.constant 0 : index
    %2 = vector.load %arg3[%c0_3, %c0_4] : memref<1x64xf32, #tpu.memory_space<vmem>>, vector<1x64xf32>
    %3 = arith.truncf %0 : vector<2x64xf32> to vector<2x64xbf16>
    %cst = arith.constant dense<0.000000e+00> : vector<2x64xf32>
    %4 = tpu.matmul %3, %1, %cst {dimension_numbers = #tpu.dot_dimension_numbers<[1], [0], [0], [1], [0, 0, 1, 1], [], []>} : vector<2x64xbf16>, vector<64x64xbf16>, vector<2x64xf32> -> vector<2x64xf32>
    %5 = vector.broadcast %2 : vector<1x64xf32> to vector<2x64xf32>
    %6 = arith.addf %4, %5 : vector<2x64xf32>
    %cst_5 = arith.constant 0.000000e+00 : f32
    %7 = vector.broadcast %cst_5 : f32 to vector<2x64xf32>
    %8 = arith.maximumf %6, %7 : vector<2x64xf32>
    %c0_6 = arith.constant 0 : index
    %c0_7 = arith.constant 0 : index
    %9 = vector.load %arg4[%c0_6, %c0_7] : memref<64x64xbf16, #tpu.memory_space<vmem>>, vector<64x64xbf16>
    %c0_8 = arith.constant 0 : index
    %c0_9 = arith.constant 0 : index
    %10 = vector.load %arg5[%c0_8, %c0_9] : memref<1x64xf32, #tpu.memory_space<vmem>>, vector<1x64xf32>
    %11 = arith.truncf %8 : vector<2x64xf32> to vector<2x64xbf16>
    %cst_10 = arith.constant dense<0.000000e+00> : vector<2x64xf32>
    %12 = tpu.matmul %11, %9, %cst_10 {dimension_numbers = #tpu.dot_dimension_numbers<[1], [0], [0], [1], [0, 0, 1, 1], [], []>} : vector<2x64xbf16>, vector<64x64xbf16>, vector<2x64xf32> -> vector<2x64xf32>
    %13 = vector.broadcast %10 : vector<1x64xf32> to vector<2x64xf32>
    %14 = arith.addf %12, %13 : vector<2x64xf32>
    %cst_11 = arith.constant 0.000000e+00 : f32
    %15 = vector.broadcast %cst_11 : f32 to vector<2x64xf32>
    %16 = arith.maximumf %14, %15 : vector<2x64xf32>
    %c0_12 = arith.constant 0 : index
    %c0_13 = arith.constant 0 : index
    %17 = vector.load %arg6[%c0_12, %c0_13] : memref<64x8xbf16, #tpu.memory_space<vmem>>, vector<64x8xbf16>
    %c0_14 = arith.constant 0 : index
    %c0_15 = arith.constant 0 : index
    %18 = vector.load %arg7[%c0_14, %c0_15] : memref<1x8xf32, #tpu.memory_space<vmem>>, vector<1x8xf32>
    %19 = arith.truncf %16 : vector<2x64xf32> to vector<2x64xbf16>
    %cst_16 = arith.constant dense<0.000000e+00> : vector<2x8xf32>
    %20 = tpu.matmul %19, %17, %cst_16 {dimension_numbers = #tpu.dot_dimension_numbers<[1], [0], [0], [1], [0, 0, 1, 1], [], []>} : vector<2x64xbf16>, vector<64x8xbf16>, vector<2x8xf32> -> vector<2x8xf32>
    %21 = vector.broadcast %18 : vector<1x8xf32> to vector<2x8xf32>
    %22 = arith.addf %20, %21 : vector<2x8xf32>
    %c0_17 = arith.constant 0 : index
    %c0_18 = arith.constant 0 : index
    %23 = vector.load %arg8[%c0_17, %c0_18] : memref<2x8xf32, #tpu.memory_space<vmem>>, vector<2x8xf32>
    tpu.vector_store %arg8[%c0_17, %c0_18], %22 {strides = array<i32>} : memref<2x8xf32, #tpu.memory_space<vmem>>, vector<2x8xf32>,
    %c0_19 = arith.constant 0 : index
    %c0_20 = arith.constant 0 : index
    %24 = vector.load %arg1[%c0_19, %c0_20] : memref<2x8xf32, #tpu.memory_space<vmem>>, vector<2x8xf32>
    %25 = arith.subf %22, %24 : vector<2x8xf32>
    %26 = arith.mulf %25, %25 : vector<2x8xf32>
    %cst_21 = arith.constant dense<0.000000e+00> : vector<2xf32>
    %27 = vector.multi_reduction <add>, %26, %cst_21 [1] : vector<2x8xf32> to vector<2xf32>
    %28 = vector.shape_cast %27 : vector<2xf32> to vector<2x1xf32>
    %cst_22 = arith.constant dense<0.000000e+00> : vector<1xf32>
    %29 = vector.multi_reduction <add>, %28, %cst_22 [0] : vector<2x1xf32> to vector<1xf32>
    %30 = vector.shape_cast %29 : vector<1xf32> to vector<1x1xf32>
    %cst_23 = arith.constant 6.250000e-02 : f32
    %31 = vector.broadcast %cst_23 : f32 to vector<1x1xf32>
    %32 = arith.mulf %30, %31 : vector<1x1xf32>
    %c0_24 = arith.constant 0 : index
    %c0_25 = arith.constant 0 : index
    %33 = vector.load %arg9[%c0_24, %c0_25] : memref<1x1xf32, #tpu.memory_space<vmem>>, vector<1x1xf32>
    tpu.vector_store %arg9[%c0_24, %c0_25], %32 {strides = array<i32>} : memref<1x1xf32, #tpu.memory_space<vmem>>, vector<1x1xf32>,
    return
  }
}

</mosaic_0001>

<bundles_post_ra>
// kernel: perturb_model_forward.25
= control target key start
LH: loop header
LB: loop body
LE: loop exit
PB: predicated region body
PF: predicated region fallthrough
CT: control target
= control target key end

     0   :  { %vm16_vm0 = vcmask 261120   ;;  %v98_v4 = vmov 32.0   ;;  %vm82_vm6 = vcmask 257024   ;;  %s141_s0 = inlined_call_operand.vmem [shape: f32[16,32], index: 0, kind: input, shape index: {}]   ;;  %s142_s1 = inlined_call_operand.vmem [shape: f32[1,32], index: 1, kind: input, shape index: {}]   ;;  %s143_s2 = inlined_call_operand.vmem [shape: f32[1,32], index: 2, kind: input, shape index: {}]   ;;  %s144_s3 = inlined_call_operand.vmem [shape: bf16[16,32], index: 3, kind: output, shape index: {}]  }
   0x1   :  { %v14_v0 = vld [vmem:[%s141_s0] sm:$0xff]  ;;  %v15_v2 = vld [vmem:[%s141_s0 + $0x8] sm:$0xff]  ;;  %92 = vrcp.f32 %v98_v4 }
   0x2   :  { %v17_v1 = vsel %vm16_vm0, %v14_v0, 0.0  ;;  %v20_v3 = vsel %vm16_vm0, %v15_v2, 0.0  ;;  %v90_v35 = vld [vmem:[%s142_s1] ss:$0 sm:$0xff] }
   0x3   :  { %18 = vadd.xlane.f32.xlu0 %v17_v1  ;;  %v91_v38 = vld [vmem:[%s143_s2] ss:$0 sm:$0xff] }
   0x7   :  { %v93_v5 = vpop.eup %92 }
   0x8   :  { %v24_v6 = vmul.f32 32.0, %v93_v5  ;;  %vm28_vm1 = vweird.f32 %v93_v5 }
   0xa   :  { %v25_v7 = vsub.f32 1.0, %v24_v6 }
   0xb   :  { %21 = vadd.xlane.f32.xlu0 %v20_v3 }
   0xc   :  { %v26_v8 = vmul.f32 %v93_v5, %v25_v7 }
   0xe   :  { %v27_v9 = vadd.f32 %v93_v5, %v26_v8 }
  0x10   :  { %v29_v10 = vsel %vm28_vm1, %v93_v5, %v27_v9 }
  0x76   :  { %v19_v11 = vpop.xlane.xlu0 %18 }
  0x77   :  { %v30_v12 = vmul.f32 %v29_v10, %v19_v11 }
  0x79   :  { %v32_v13 = vsub.f32 %v14_v0, %v30_v12 }
  0x7b   :  { %v34_v14 = vmul.f32 %v32_v13, %v32_v13 }
  0x7d   :  { %v36_v15 = vsel %vm16_vm0, %v34_v14, 0.0 }
  0x7e   :  { %37 = vadd.xlane.f32.xlu1 %v36_v15  ;;  %v22_v16 = vpop.xlane.xlu0 %21 }
  0x7f   :  { %v31_v17 = vmul.f32 %v29_v10, %v22_v16 }
  0x81   :  { %v33_v18 = vsub.f32 %v15_v2, %v31_v17 }
  0x83   :  { %v35_v19 = vmul.f32 %v33_v18, %v33_v18 }
  0x85   :  { %v39_v20 = vsel %vm16_vm0, %v35_v19, 0.0 }
  0x86   :  { %40 = vadd.xlane.f32.xlu1 %v39_v20 }
  0xf1   :  { %v38_v21 = vpop.xlane.xlu1 %37 }
  0xf2   :  { %v42_v22 = vmul.f32 %v38_v21, %v29_v10 }
  0xf4   :  { %v44_v23 = vadd.f32 1e-05, %v42_v22 }
  0xf6   :  { %94 = vrsqrt.f32 %v44_v23  ;;  %vm52_vm3 = vweird.f32 %v44_v23 }
  0xf9   :  { %v41_v24 = vpop.xlane.xlu1 %40 }
  0xfa   :  { %v43_v25 = vmul.f32 %v41_v24, %v29_v10 }
  0xfc   :  { %v95_v26 = vpop.eup %94  ;;  %v45_v27 = vadd.f32 1e-05, %v43_v25 }
  0xfd   :  { %v47_v28 = vmul.f32 %v95_v26, %v44_v23  ;;  %vm53_vm2 = vweird.f32 %v95_v26 }
  0xfe   :  { %96 = vrsqrt.f32 %v45_v27  ;;  %vm54_vm4 = vmor %vm52_vm3, %vm53_vm2  ;;  %vm62_vm7 = vweird.f32 %v45_v27 }
  0xff   :  { %v48_v29 = vmul.f32 %v95_v26, %v47_v28 }
 0x101   :  { %v49_v30 = vmul.f32 0.5, %v48_v29 }
 0x103   :  { %v50_v31 = vsub.f32 1.5, %v49_v30 }
 0x104   :  { %v97_v32 = vpop.eup %96 }
 0x105   :  { %v51_v33 = vmul.f32 %v95_v26, %v50_v31  ;;  %v57_v34 = vmul.f32 %v97_v32, %v45_v27  ;;  %vm63_vm5 = vweird.f32 %v97_v32 }
 0x106   :  { %vm64_vm8 = vmor %vm62_vm7, %vm63_vm5 }
 0x107   :  { %v55_v36 = vsel %vm54_vm4, %v95_v26, %v51_v33  ;;  %v58_v37 = vmul.f32 %v97_v32, %v57_v34 }
 0x108   :  { %v66_v39 = vmul.f32 %v55_v36, %v32_v13 }
 0x109   :  { %v59_v40 = vmul.f32 0.5, %v58_v37 }
 0x10a   :  { %v72_v41 = vmul.f32 %v90_v35, %v66_v39 }
 0x10b   :  { %v60_v42 = vsub.f32 1.5, %v59_v40 }
 0x10c   :  { %v78_v43 = vadd.f32 %v91_v38, %v72_v41 }
 0x10d   :  { %v61_v44 = vmul.f32 %v97_v32, %v60_v42 }
 0x10e   :  { %v80_v45 = vpack.c.bf16 %v78_v43, %v78_v43 }
 0x10f   :  { %v65_v46 = vsel %vm64_vm8, %v97_v32, %v61_v44 }
 0x110   :  { %83 = vst.msk [vmem:[%s144_s3] sm:$0xf] %vm82_vm6, %v80_v45  ;;  %v67_v47 = vmul.f32 %v65_v46, %v33_v18 }
 0x112   :  { %v73_v48 = vmul.f32 %v90_v35, %v67_v47 }
 0x114   :  { %v79_v49 = vadd.f32 %v91_v38, %v73_v48 }
 0x116   :  { %v81_v50 = vpack.c.bf16 %v79_v49, %v79_v49 }
 0x118   :  { %84 = vst.msk [vmem:[%s144_s3 + $0x4] sm:$0xf] %vm82_vm6, %v81_v50 }

// kernel: perturb_model_forward.26
= control target key start
LH: loop header
LB: loop body
LE: loop exit
PB: predicated region body
PF: predicated region fallthrough
CT: control target
= control target key end

     0   :  { %vm22_vm0 = vcmask 785408   ;;  %v139_v1 = vmov 0.0   ;;  %vm50_vm1 = vcmask 261120   ;;  %vm86_vm2 = vcmask 257024   ;;  %s141_s27 = smov 96   ;;  %s212_s1 = inlined_call_operand.vmem [shape: bf16[32,96], index: 1, kind: input, shape index: {}]   ;;  %s213_s0 = inlined_call_operand.vmem [shape: bf16[16,32], index: 0, kind: input, shape index: {}]   ;;  %s214_s2 = inlined_call_operand.vmem [shape: f32[1,96], index: 2, kind: input, shape index: {}]   ;;  %s215_s3 = inlined_call_operand.vmem [shape: bf16[16,32], index: 3, kind: output, shape index: {0}]   ;;  %s216_s5 = inlined_call_operand.vmem [shape: bf16[16,32], index: 5, kind: output, shape index: {2}]   ;;  %s217_s4 = inlined_call_operand.vmem [shape: bf16[16,32], index: 4, kind: output, shape index: {1}]  }
   0x1   :  { %v134_v0 = vld [vmem:[%s212_s1 + $0x8] sm:$0xff]  ;;  %23 = vst.msk [vmem:[#allocation2] sm:$0xff] %vm22_vm0, %v139_v1  ;;  %v133_v2 = vld [vmem:[%s212_s1] sm:$0xff] }
   0x2   :  { %24 = vst.msk [vmem:[#allocation2 + $0x8] sm:$0xff] %vm22_vm0, %v139_v1  ;;  %60 = vmatpush.bf16.msra.mxu0 %v134_v0  ;;  %v132_v3 = vld [vmem:[%s213_s0] sm:$0xff]  ;;  %s140_s0 = smov 64  }
   0x3   :  { %v138_v8 = vld [vmem:[%s214_s2] ss:$0 sm:$0xff] }
   0x6   :  { %61 = vmatpush.bf16.msra.mxu0 %v133_v2 }
   0x8   :  { %v25_v4 = vld [vmem:[#allocation2] sm:$0xff] }
   0x9   :  { %131 = vmatmul.msk.bf16.vlgmr.msra.gmra.mxu0 %vm50_vm1, %v132_v3  ;;  %v26_v7 = vld [vmem:[#allocation2 + $0x8] sm:$0xff] }
  0x86   :  { %v63_v5 = vpop.f32.mrf.mxu0 }
  0x87   :  { %v68_v6 = vadd.f32 %v63_v5, %v25_v4 }
  0x89   :  { %71 = vst.msk [vmem:[#allocation2] sm:$0xff] %vm22_vm0, %v68_v6 }
  0x8e   :  { %v65_v9 = vpop.f32.mrf.mxu0 }
  0x8f   :  { %v69_v10 = vadd.f32 %v65_v9, %v26_v7 }
  0x90   :  { %v76_v11 = vld [vmem:[#allocation2] sm:$0xff] }
  0x91   :  { %72 = vst.msk [vmem:[#allocation2 + $0x8] sm:$0xff] %vm22_vm0, %v69_v10  ;;  %v82_v12 = vadd.f32 %v138_v8, %v76_v11 }
  0x93   :  { %v84_v13 = vpack.c.bf16 %v82_v12, %v82_v12 }
  0x95   :  { %99 = vrot.lane.b32.xlu1 %v84_v13, %s140_s0  ;;  %87 = vst.msk [vmem:[%s215_s3] sm:$0xf] %vm86_vm2, %v84_v13  ;;  %91 = vrot.lane.b32.xlu0 %v84_v13, %s141_s27 }
  0x98   :  { %v77_v14 = vld [vmem:[#allocation2 + $0x8] sm:$0xff] }
  0x99   :  { %v83_v15 = vadd.f32 %v138_v8, %v77_v14 }
  0x9b   :  { %v85_v16 = vpack.c.bf16 %v83_v15, %v83_v15 }
  0x9d   :  { %101 = vrot.lane.b32.xlu1 %v85_v16, %s140_s0  ;;  %88 = vst.msk [vmem:[%s215_s3 + $0x4] sm:$0xf] %vm86_vm2, %v85_v16  ;;  %93 = vrot.lane.b32.xlu0 %v85_v16, %s141_s27 }
 0x107   :  { %v100_v17 = vpop.permute.xlu1 %99  ;;  %v92_v18 = vpop.permute.xlu0 %91 }
 0x108   :  { %105 = vst.msk [vmem:[%s216_s5] sm:$0xf] %vm86_vm2, %v100_v17 }
 0x109   :  { %97 = vst.msk [vmem:[%s217_s4] sm:$0xf] %vm86_vm2, %v92_v18 }
 0x10f   :  { %v102_v19 = vpop.permute.xlu1 %101  ;;  %v94_v20 = vpop.permute.xlu0 %93 }
 0x110   :  { %106 = vst.msk [vmem:[%s216_s5 + $0x4] sm:$0xf] %vm86_vm2, %v102_v19 }
 0x111   :  { %98 = vst.msk [vmem:[%s217_s4 + $0x4] sm:$0xf] %vm86_vm2, %v94_v20 }

// kernel: perturb_model_forward.28
= control target key start
LH: loop header
LB: loop body
LE: loop exit
PB: predicated region body
PF: predicated region fallthrough
CT: control target
= control target key end

     0   :  { %vm28_vm0 = vcmask 261120   ;;  %v198_v1 = vmov 0.0   ;;  %v199_v22 = vmov 32.0   ;;  %vm160_vm6 = vcmask 257024   ;;  %s271_s1 = inlined_call_operand.vmem [shape: bf16[32,32], index: 1, kind: input, shape index: {}]   ;;  %s272_s0 = inlined_call_operand.vmem [shape: bf16[16,32], index: 0, kind: input, shape index: {}]   ;;  %s273_s2 = inlined_call_operand.vmem [shape: f32[1,32], index: 2, kind: input, shape index: {}]   ;;  %s274_s3 = inlined_call_operand.vmem [shape: bf16[16,32], index: 3, kind: input, shape index: {}]   ;;  %s275_s4 = inlined_call_operand.vmem [shape: f32[1,32], index: 4, kind: input, shape index: {}]   ;;  %s276_s5 = inlined_call_operand.vmem [shape: f32[1,32], index: 5, kind: input, shape index: {}]   ;;  %s277_s6 = inlined_call_operand.vmem [shape: bf16[16,32], index: 6, kind: output, shape index: {}]  }
   0x1   :  { %v182_v0 = vld [vmem:[%s271_s1 + $0x8] sm:$0xff]  ;;  %29 = vst.msk [vmem:[#allocation2] sm:$0xff] %vm28_vm0, %v198_v1  ;;  %v181_v2 = vld [vmem:[%s271_s1] sm:$0xff]  ;;  %192 = vrcp.f32 %v199_v22 }
   0x2   :  { %30 = vst.msk [vmem:[#allocation2 + $0x8] sm:$0xff] %vm28_vm0, %v198_v1  ;;  %66 = vmatpush.bf16.msra.mxu0 %v182_v0  ;;  %v180_v3 = vld [vmem:[%s272_s0] sm:$0xff] }
   0x3   :  { %v184_v8 = vld [vmem:[%s274_s3] sm:$0xff]  }
   0x4   :  { %v189_v9 = vld [vmem:[%s273_s2] ss:$0 sm:$0xff]  ;;  %v185_v12 = vunpack.c.l.bf16 %v184_v8  ;;  %v186_v17 = vunpack.c.h.bf16 %v184_v8 }
   0x5   :  { %v190_v53 = vld [vmem:[%s275_s4] ss:$0 sm:$0xff] }
   0x6   :  { %67 = vmatpush.bf16.msra.mxu0 %v181_v2  ;;  %v191_v56 = vld [vmem:[%s276_s5] ss:$0 sm:$0xff] }
   0x7   :  { %v193_v23 = vpop.eup %192 }
   0x8   :  { %v31_v4 = vld [vmem:[#allocation2] sm:$0xff]  ;;  %v102_v24 = vmul.f32 32.0, %v193_v23  ;;  %vm106_vm1 = vweird.f32 %v193_v23 }
   0x9   :  { %179 = vmatmul.msk.bf16.vlgmr.msra.gmra.mxu0 %vm28_vm0, %v180_v3  ;;  %v32_v7 = vld [vmem:[#allocation2 + $0x8] sm:$0xff] }
   0xa   :  { %v103_v25 = vsub.f32 1.0, %v102_v24 }
   0xc   :  { %v104_v26 = vmul.f32 %v193_v23, %v103_v25 }
   0xe   :  { %v105_v27 = vadd.f32 %v193_v23, %v104_v26 }
  0x10   :  { %v107_v28 = vsel %vm106_vm1, %v193_v23, %v105_v27 }
  0x86   :  { %v69_v5 = vpop.f32.mrf.mxu0 }
  0x87   :  { %v74_v6 = vadd.f32 %v69_v5, %v31_v4 }
  0x89   :  { %76 = vst.msk [vmem:[#allocation2] sm:$0xff] %vm28_vm0, %v74_v6 }
  0x8e   :  { %v71_v10 = vpop.f32.mrf.mxu0 }
  0x8f   :  { %v75_v11 = vadd.f32 %v71_v10, %v32_v7 }
  0x90   :  { %v81_v13 = vld [vmem:[#allocation2] sm:$0xff] }
  0x91   :  { %77 = vst.msk [vmem:[#allocation2 + $0x8] sm:$0xff] %vm28_vm0, %v75_v11  ;;  %v87_v14 = vadd.f32 %v189_v9, %v81_v13 }
  0x93   :  { %v93_v15 = vadd.f32 %v185_v12, %v87_v14 }
  0x95   :  { %v95_v16 = vsel %vm28_vm0, %v93_v15, 0.0 }
  0x96   :  { %96 = vadd.xlane.f32.xlu0 %v95_v16 }
  0x98   :  { %v82_v18 = vld [vmem:[#allocation2 + $0x8] sm:$0xff] }
  0x99   :  { %v88_v19 = vadd.f32 %v189_v9, %v82_v18 }
  0x9b   :  { %v94_v20 = vadd.f32 %v186_v17, %v88_v19 }
  0x9d   :  { %v98_v21 = vsel %vm28_vm0, %v94_v20, 0.0 }
  0x9e   :  { %99 = vadd.xlane.f32.xlu0 %v98_v21 }
 0x109   :  { %v97_v29 = vpop.xlane.xlu0 %96 }
 0x10a   :  { %v108_v30 = vmul.f32 %v107_v28, %v97_v29 }
 0x10c   :  { %v110_v31 = vsub.f32 %v93_v15, %v108_v30 }
 0x10e   :  { %v112_v32 = vmul.f32 %v110_v31, %v110_v31 }
 0x110   :  { %v114_v33 = vsel %vm28_vm0, %v112_v32, 0.0 }
 0x111   :  { %115 = vadd.xlane.f32.xlu1 %v114_v33  ;;  %v100_v34 = vpop.xlane.xlu0 %99 }
 0x112   :  { %v109_v35 = vmul.f32 %v107_v28, %v100_v34 }
 0x114   :  { %v111_v36 = vsub.f32 %v94_v20, %v109_v35 }
 0x116   :  { %v113_v37 = vmul.f32 %v111_v36, %v111_v36 }
 0x118   :  { %v117_v38 = vsel %vm28_vm0, %v113_v37, 0.0 }
 0x119   :  { %118 = vadd.xlane.f32.xlu1 %v117_v38 }
 0x184   :  { %v116_v39 = vpop.xlane.xlu1 %115 }
 0x185   :  { %v120_v40 = vmul.f32 %v116_v39, %v107_v28 }
 0x187   :  { %v122_v41 = vadd.f32 1e-05, %v120_v40 }
 0x189   :  { %194 = vrsqrt.f32 %v122_v41  ;;  %vm130_vm3 = vweird.f32 %v122_v41 }
 0x18c   :  { %v119_v42 = vpop.xlane.xlu1 %118 }
 0x18d   :  { %v121_v43 = vmul.f32 %v119_v42, %v107_v28 }
 0x18f   :  { %v195_v44 = vpop.eup %194  ;;  %v123_v45 = vadd.f32 1e-05, %v121_v43 }
 0x190   :  { %v125_v46 = vmul.f32 %v195_v44, %v122_v41  ;;  %vm131_vm2 = vweird.f32 %v195_v44 }
 0x191   :  { %196 = vrsqrt.f32 %v123_v45  ;;  %vm132_vm4 = vmor %vm130_vm3, %vm131_vm2  ;;  %vm140_vm7 = vweird.f32 %v123_v45 }
 0x192   :  { %v126_v47 = vmul.f32 %v195_v44, %v125_v46 }
 0x194   :  { %v127_v48 = vmul.f32 0.5, %v126_v47 }
 0x196   :  { %v128_v49 = vsub.f32 1.5, %v127_v48 }
 0x197   :  { %v197_v50 = vpop.eup %196 }
 0x198   :  { %v129_v51 = vmul.f32 %v195_v44, %v128_v49  ;;  %v135_v52 = vmul.f32 %v197_v50, %v123_v45  ;;  %vm141_vm5 = vweird.f32 %v197_v50 }
 0x199   :  { %vm142_vm8 = vmor %vm140_vm7, %vm141_vm5 }
 0x19a   :  { %v133_v54 = vsel %vm132_vm4, %v195_v44, %v129_v51  ;;  %v136_v55 = vmul.f32 %v197_v50, %v135_v52 }
 0x19b   :  { %v144_v57 = vmul.f32 %v133_v54, %v110_v31 }
 0x19c   :  { %v137_v58 = vmul.f32 0.5, %v136_v55 }
 0x19d   :  { %v150_v59 = vmul.f32 %v190_v53, %v144_v57 }
 0x19e   :  { %v138_v60 = vsub.f32 1.5, %v137_v58 }
 0x19f   :  { %v156_v61 = vadd.f32 %v191_v56, %v150_v59 }
 0x1a0   :  { %v139_v62 = vmul.f32 %v197_v50, %v138_v60 }
 0x1a1   :  { %v158_v63 = vpack.c.bf16 %v156_v61, %v156_v61 }
 0x1a2   :  { %v143_v0 = vsel %vm142_vm8, %v197_v50, %v139_v62 }
 0x1a3   :  { %161 = vst.msk [vmem:[%s277_s6] sm:$0xf] %vm160_vm6, %v158_v63  ;;  %v145_v1 = vmul.f32 %v143_v0, %v111_v36 }
 0x1a5   :  { %v151_v2 = vmul.f32 %v190_v53, %v145_v1 }
 0x1a7   :  { %v157_v3 = vadd.f32 %v191_v56, %v151_v2 }
 0x1a9   :  { %v159_v4 = vpack.c.bf16 %v157_v3, %v157_v3 }
 0x1ab   :  { %162 = vst.msk [vmem:[%s277_s6 + $0x4] sm:$0xf] %vm160_vm6, %v159_v4 }

// kernel: perturb_model_forward.27
= control target key start
LH: loop header
LB: loop body
LE: loop exit
PB: predicated region body
PF: predicated region fallthrough
CT: control target
= control target key end

     0   :  { %s787_s15 = smov 0   ;;  %s789_s16 = smov 0   ;;  %s872_s0 = inlined_call_operand.vmem [shape: bf16[2,8,32], index: 0, kind: input, shape index: {}]   ;;  %s873_s1 = inlined_call_operand.vmem [shape: bf16[2,8,32], index: 1, kind: input, shape index: {}]   ;;  %s874_s2 = inlined_call_operand.vmem [shape: bf16[2,8,32], index: 2, kind: input, shape index: {}]   ;;  %s875_s3 = inlined_call_operand.vmem [shape: f32[2,1,8], index: 3, kind: input, shape index: {}]   ;;  %s876_s4 = inlined_call_operand.vmem [shape: bf16[2,8,32], index: 4, kind: output, shape index: {}]  }
   0x1   :  { %s791_s17 = smov 0  }
   0x2 LB: > { %s26_s18 = sadd.s32 1, %s750_s16  ;;  %p671_p0 = scmp.ge.s32.totalorder %s754_s17, 1  ;;  %s754_s17 = sphi %s791_s17, %s14_s17   ;;  %s750_s16 = sphi %s789_s16, %s878_s16   ;;  %s746_s15 = sphi %s787_s15, %s877_s15  }
   0x3   : > { %p28_p1 = scmp.ge.s32.totalorder %s26_s18, 2  ;;  %p216_p2 = scmp.lt.s32.totalorder %s754_s17, 3 }
   0x5   : > { %s880_s18 = smov (%p28_p1, %s26_s18), 0  ;;  %p217_p3 = pnand %p671_p0, %p216_p2 }
   0x6   : > { %p263_p4 = scmp.lt.s32.totalorder (!%p217_p3), %s746_s15, 1  ;;  %s756_s26 = smov (!%p217_p3), 112  }
   0x7   : > { %220 = sbr.rel (%p217_p3) target bundleno = 1082 (0x43a), region = 36  ;;  %s757_s27 = smov (!%p217_p3), 104  }
   0x8   : > { %s758_s5 = smov (!%p217_p3), 120   ;;  %s759_s9 = smov (!%p217_p3), 8  }
   0x9   : > { %s760_s10 = smov (!%p217_p3), 16   ;;  %s761_s11 = smov (!%p217_p3), 24  }
   0xc   : > { %s882_s15 = smov (!%p263_p4, %s746_s15), 1  ;;  %vm307_vm0 = vcmask 64512   ;;  %vm342_vm1 = vcmask 1043456   ;;  %vm547_vm2 = vcmask 130048   ;;  %vm549_vm3 = vcmask 195584  }
   0xd   : > { %s805_s19 = sshll.u32 %s882_s15, 2  ;;  %s286_s30 = scalar_lea.vmem %s875_s3, %s882_s15  ;;  %vm552_vm4 = vcmask 257024  }
   0xe   : > { %s276_s22 = scalar_lea.vmem %s873_s1, %s805_s19  ;;  %s269_s25 = scalar_lea.vmem %s872_s0, %s805_s19  ;;  %v298_v8 = vld [vmem:[%s286_s30] sm:$0x1] }
   0xf   : > { %v296_v0 = vld [vmem:[%s276_s22] sm:$0xf]  ;;  %v299_v9 = vsub.f32 1.0, %v298_v8  ;;  %s283_s8 = scalar_lea.vmem %s874_s2, %s805_s19  ;;  %s293_s14 = scalar_lea.vmem %s876_s4, %s805_s19 }
  0x10   : > { %v295_v1 = vld [vmem:[%s269_s25] sm:$0xf]  ;;  %v312_v2 = vsel %vm307_vm0, %v296_v0, 0  ;;  %v363_v6 = vunpack.c.l.b16 %v296_v0 }
  0x11   : > { %v301_v3 = vunpack.c.l.bf16 %v295_v1  ;;  %321 = vmatpush.bf16.xpose.msra.mxu0 %v312_v2  ;;  %v300_v10 = vmul.f32 -1e+09, %v299_v9  ;;  %v297_v26 = vld [vmem:[%s283_s8] sm:$0xf] }
  0x12   : > { %v364_v7 = vpack.c.b16 %v363_v6, %v363_v6  ;;  %v344_v27 = vsel %vm342_vm1, %v297_v26, 0  ;;  %v399_v50 = vunpack.c.l.b16 %v297_v26 }
  0x13   : > { %v302_v4 = vmul.f32 0.35355338, %v301_v3  ;;  %v305_v11 = vperm.slane %v300_v10, 0  ;;  %353 = vmatpush.bf16.msra.mxu1 %v344_v27 }
  0x14   : > { %424 = vrot.lane.b32.xlu2 %v364_v7, %s756_s26  ;;  %v400_v51 = vpack.c.b16 %v399_v50, %v399_v50 }
  0x15   : > { %v303_v5 = vpack.c.bf16 %v302_v4, %v302_v4 }
  0x18   : > { %676 = vmatmul.msk.bf16.vlgmr.msra.gmra.mxu0 %vm307_vm0, %v303_v5 }
  0x1c   : > { %480 = vrot.lane.b32.xlu2 %v364_v7, %s757_s27 }
  0x24   : > { %422 = vrot.lane.b32.xlu2 %v303_v5, %s756_s26 }
  0x2c   : > { %478 = vrot.lane.b32.xlu2 %v303_v5, %s757_s27 }
  0x6e   : > { %v425_v16 = vpop.permute.xlu2 %424 }
  0x6f   : > { %v430_v28 = vsel %vm307_vm0, %v425_v16, 0 }
  0x70   : > { %439 = vmatpush.bf16.xpose.msrb.mxu1 %v430_v28 }
  0x76   : > { %v481_v17 = vpop.permute.xlu2 %480 }
  0x77   : > { %v486_v22 = vsel %vm307_vm0, %v481_v17, 0 }
  0x78   : > { %495 = vmatpush.bf16.xpose.msrb.mxu0 %v486_v22 }
  0x7e   : > { %v423_v21 = vpop.permute.xlu2 %422 }
  0x86   : > { %v479_v25 = vpop.permute.xlu2 %478 }
  0x87   : > { %682 = vmatmul.msk.bf16.vlgmr.msrb.gmra.mxu0 %vm307_vm0, %v479_v25 }
  0x95   : > { %v323_v12 = vpop.f32.mrf.mxu0 }
  0x96   : > { %v324_v13 = vadd.f32 %v323_v12, %v305_v11 }
  0x98   : > { %v327_v14 = vsel %vm307_vm0, %v324_v13, -inf }
  0x99   : > { %328 = vmax.xlane.f32.xlu0 %v327_v14 }
  0x9d   : > { %v325_v15 = vpop.f32.mrf.mxu0 }
  0xad   : > { %365 = vrot.lane.b32.xlu0 %v364_v7, %s758_s5 }
 0x104   : > { %v497_v35 = vpop.f32.mrf.mxu0 }
 0x105   : > { %v498_v36 = vadd.f32 %v497_v35, %v305_v11 }
 0x107   : > { %v501_v37 = vsel %vm307_vm0, %v498_v36, -inf }
 0x10c   : > { %v329_v18 = vpop.xlane.xlu0 %328  ;;  %v499_v38 = vpop.f32.mrf.mxu0 }
 0x10d   : > { %v330_v19 = vsub.f32 %v324_v13, %v329_v18 }
 0x10f   : > { %v331_v20 = vmul.f32 1.442695, %v330_v19 }
 0x111   : > { %716 = vpow2.f32 %v331_v20 }
 0x117   : > { %v717_v23 = vpop.eup %716 }
 0x118   : > { %v333_v24 = vsel %vm307_vm0, %v717_v23, 0.0 }
 0x119   : > { %334 = vadd.xlane.f32.xlu1 %v333_v24 }
 0x11f   : > { %v366_v29 = vpop.permute.xlu0 %365 }
 0x120   : > { %v371_v30 = vsel %vm307_vm0, %v366_v29, 0 }
 0x121   : > { %380 = vmatpush.bf16.xpose.msra.mxu2 %v371_v30 }
 0x132   : > { %360 = vrot.lane.b32.xlu1 %v303_v5, %s758_s5 }
 0x15c   : > { %502 = vmax.xlane.f32.xlu1 %v501_v37 }
 0x18c   : > { %v335_v31 = vpop.xlane.xlu1 %334 }
 0x18d   : > { %718 = vrcp.f32 %v335_v31 }
 0x193   : > { %v719_v32 = vpop.eup %718 }
 0x194   : > { %v337_v33 = vmul.f32 %v719_v32, %v717_v23 }
 0x196   : > { %v338_v34 = vpack.c.bf16 %v337_v33, %v337_v33 }
 0x198   : > { %677 = vmatmul.msk.bf16.vlgmr.msra.gmra.mxu1 %vm307_vm0, %v338_v34 }
 0x1a4   : > { %v361_v39 = vpop.permute.xlu1 %360 }
 0x1a5   : > { %678 = vmatmul.msk.bf16.vlgmr.msra.gmra.mxu2 %vm307_vm0, %v361_v39 }
 0x1a8   : > { %680 = vmatmul.msk.bf16.vlgmr.msrb.gmra.mxu1 %vm307_vm0, %v423_v21 }
 0x1cf   : > { %v503_v54 = vpop.xlane.xlu1 %502 }
 0x1d0   : > { %v504_v58 = vsub.f32 %v498_v36, %v503_v54 }
 0x1d2   : > { %v505_v60 = vmul.f32 1.442695, %v504_v58 }
 0x215   : > { %v841_v40 = vpop.f32.mrf.mxu1 }
 0x21d   : > { %v357_v41 = vpop.f32.mrf.mxu1 }
 0x225   : > { %v441_v42 = vpop.f32.mrf.mxu1 }
 0x226   : > { %v442_v43 = vadd.f32 %v441_v42, %v305_v11 }
 0x228   : > { %v382_v44 = vpop.f32.mrf.mxu2  ;;  %v445_v45 = vsel %vm307_vm0, %v442_v43, -inf }
 0x229   : > { %v383_v46 = vadd.f32 %v382_v44, %v305_v11  ;;  %446 = vmax.xlane.f32.xlu2 %v445_v45 }
 0x22b   : > { %v386_v47 = vsel %vm307_vm0, %v383_v46, -inf }
 0x22c   : > { %387 = vmax.xlane.f32.xlu0 %v386_v47 }
 0x22d   : > { %v443_v48 = vpop.f32.mrf.mxu1 }
 0x230   : > { %v384_v49 = vpop.f32.mrf.mxu2 }
 0x241   : > { %401 = vrot.lane.b32.xlu2 %v400_v51, %s758_s5 }
 0x29c   : > { %v447_v52 = vpop.xlane.xlu2 %446 }
 0x29d   : > { %v448_v53 = vsub.f32 %v442_v43, %v447_v52 }
 0x29f   : > { %v449_v55 = vmul.f32 1.442695, %v448_v53  ;;  %v388_v56 = vpop.xlane.xlu0 %387 }
 0x2a0   : > { %v389_v57 = vsub.f32 %v383_v46, %v388_v56 }
 0x2a1   : > { %720 = vpow2.f32 %v449_v55 }
 0x2a2   : > { %v390_v59 = vmul.f32 1.442695, %v389_v57 }
 0x2a4   : > { %722 = vpow2.f32 %v390_v59  ;;  %v402_v3 = vpop.permute.xlu2 %401 }
 0x2a5   : > { %724 = vpow2.f32 %v505_v60  ;;  %v407_v4 = vsel %vm342_vm1, %v402_v3, 0 }
 0x2a6   : > { %416 = vmatpush.bf16.msra.mxu3 %v407_v4 }
 0x2a7   : > { %v721_v61 = vpop.eup %720 }
 0x2a8   : > { %v451_v62 = vsel %vm307_vm0, %v721_v61, 0.0 }
 0x2a9   : > { %452 = vadd.xlane.f32.xlu1 %v451_v62 }
 0x2aa   : > { %v723_v63 = vpop.eup %722 }
 0x2ab   : > { %v392_v0 = vsel %vm307_vm0, %v723_v63, 0.0  ;;  %v725_v1 = vpop.eup %724 }
 0x2ac   : > { %393 = vadd.xlane.f32.xlu0 %v392_v0  ;;  %v507_v2 = vsel %vm307_vm0, %v725_v1, 0.0 }
 0x2b4   : > { %508 = vadd.xlane.f32.xlu0 %v507_v2 }
 0x2c2   : > { %457 = vrot.lane.b32.xlu1 %v400_v51, %s756_s26 }
 0x2c8   : > { %513 = vrot.lane.b32.xlu0 %v400_v51, %s757_s27 }
 0x31c   : > { %v453_v8 = vpop.xlane.xlu1 %452 }
 0x31f   : > { %v394_v5 = vpop.xlane.xlu0 %393 }
 0x320   : > { %726 = vrcp.f32 %v394_v5 }
 0x321   : > { %728 = vrcp.f32 %v453_v8 }
 0x326   : > { %v727_v6 = vpop.eup %726 }
 0x327   : > { %v396_v7 = vmul.f32 %v727_v6, %v723_v63  ;;  %v509_v10 = vpop.xlane.xlu0 %508  ;;  %v729_v11 = vpop.eup %728 }
 0x328   : > { %730 = vrcp.f32 %v509_v10  ;;  %v455_v13 = vmul.f32 %v729_v11, %v721_v61 }
 0x329   : > { %v397_v9 = vpack.c.bf16 %v396_v7, %v396_v7 }
 0x32a   : > { %v456_v17 = vpack.c.bf16 %v455_v13, %v455_v13 }
 0x32b   : > { %679 = vmatmul.msk.bf16.vlgmr.msra.gmra.mxu3 %vm307_vm0, %v397_v9 }
 0x32e   : > { %v731_v15 = vpop.eup %730 }
 0x32f   : > { %v511_v16 = vmul.f32 %v731_v15, %v725_v1 }
 0x331   : > { %v512_v20 = vpack.c.bf16 %v511_v16, %v511_v16 }
 0x334   : > { %v458_v12 = vpop.permute.xlu1 %457 }
 0x335   : > { %v463_v14 = vsel %vm342_vm1, %v458_v12, 0 }
 0x336   : > { %472 = vmatpush.bf16.msrb.mxu3 %v463_v14 }
 0x33a   : > { %v514_v18 = vpop.permute.xlu0 %513 }
 0x33b   : > { %681 = vmatmul.msk.bf16.vlgmr.msrb.gmra.mxu3 %vm307_vm0, %v456_v17  ;;  %v519_v19 = vsel %vm342_vm1, %v514_v18, 0 }
 0x33c   : > { %528 = vmatpush.bf16.msrb.mxu2 %v519_v19 }
 0x33f   : > { %683 = vmatmul.msk.bf16.vlgmr.msrb.gmra.mxu2 %vm307_vm0, %v512_v20 }
 0x3ae   : > { %v418_v21 = vpop.f32.mrf.mxu3 }
 0x3af   : > { %535 = vrot.lane.b32.xlu2 %v418_v21, %s759_s9 }
 0x3b6   : > { %v420_v22 = vpop.f32.mrf.mxu3 }
 0x3be   : > { %v474_v23 = vpop.f32.mrf.mxu3 }
 0x3bf   : > { %539 = vrot.lane.b32.xlu2 %v474_v23, %s760_s10 }
 0x3c2   : > { %v530_v24 = vpop.f32.mrf.mxu2 }
 0x3c3   : > { %543 = vrot.lane.b32.xlu0 %v530_v24, %s761_s11 }
 0x3c6   : > { %v476_v25 = vpop.f32.mrf.mxu3 }
 0x3ca   : > { %v532_v26 = vpop.f32.mrf.mxu2 }
 0x409   : > { %v536_v27 = vpop.permute.xlu2 %535 }
 0x40a   : > { %v546_v29 = vsel %vm307_vm0, %v841_v40, %v536_v27 }
 0x419   : > { %v540_v28 = vpop.permute.xlu2 %539 }
 0x41a   : > { %v548_v30 = vsel %vm547_vm2, %v546_v29, %v540_v28 }
 0x435   : > { %v544_v31 = vpop.permute.xlu0 %543 }
 0x436   : > { %v550_v32 = vsel %vm549_vm3, %v548_v30, %v544_v31 }
 0x437   : > { %v551_v33 = vpack.c.bf16 %v550_v32, %v550_v32 }
 0x439   : > { %553 = vst.msk [vmem:[%s293_s14] sm:$0xf] %vm552_vm4, %v551_v33 }
 0x43a PF: > { %s14_s17 = sadd.s32 1, %s754_s17   ;;  %s877_s15 = smov %s750_s16 }
 0x43b   : > { %p11_p5 = scmp.ge.s32.totalorder %s14_s17, 4   ;;  %s878_s16 = smov %s880_s18 }
 0x43d   :  { %13 = sbr.rel (!%p11_p5) target bundleno = 2 (0x2), region = 75 }

// kernel: perturb_model_forward.29
= control target key start
LH: loop header
LB: loop body
LE: loop exit
PB: predicated region body
PF: predicated region fallthrough
CT: control target
= control target key end

     0   :  { %vm19_vm0 = vcmask 523264   ;;  %v130_v1 = vmov 0.0   ;;  %vm47_vm1 = vcmask 261120   ;;  %vm101_vm2 = vcmask 519168   ;;  %s173_s1 = inlined_call_operand.vmem [shape: bf16[32,64], index: 1, kind: input, shape index: {}]   ;;  %s174_s2 = inlined_call_operand.vmem [shape: f32[1,64], index: 2, kind: input, shape index: {}]   ;;  %s175_s0 = inlined_call_operand.vmem [shape: bf16[16,32], index: 0, kind: input, shape index: {}]   ;;  %s176_s3 = inlined_call_operand.vmem [shape: bf16[16,64], index: 3, kind: output, shape index: {}]  }
   0x1   :  { %v123_v0 = vld [vmem:[%s173_s1 + $0x8] sm:$0xff]  ;;  %20 = vst.msk [vmem:[#allocation2] sm:$0xff] %vm19_vm0, %v130_v1  ;;  %v122_v2 = vld [vmem:[%s173_s1] sm:$0xff] }
   0x2   :  { %21 = vst.msk [vmem:[#allocation2 + $0x8] sm:$0xff] %vm19_vm0, %v130_v1  ;;  %57 = vmatpush.bf16.msra.mxu0 %v123_v0  ;;  %v121_v3 = vld [vmem:[%s175_s0] sm:$0xff] }
   0x3   :  { %v125_v8 = vld [vmem:[%s174_s2] ss:$0 sm:$0xff] }
   0x6   :  { %58 = vmatpush.bf16.msra.mxu0 %v122_v2 }
   0x8   :  { %v22_v4 = vld [vmem:[#allocation2] sm:$0xff] }
   0x9   :  { %120 = vmatmul.msk.bf16.vlgmr.msra.gmra.mxu0 %vm47_vm1, %v121_v3  ;;  %v23_v7 = vld [vmem:[#allocation2 + $0x8] sm:$0xff] }
  0x86   :  { %v60_v5 = vpop.f32.mrf.mxu0 }
  0x87   :  { %v65_v6 = vadd.f32 %v60_v5, %v22_v4 }
  0x89   :  { %68 = vst.msk [vmem:[#allocation2] sm:$0xff] %vm19_vm0, %v65_v6 }
  0x8e   :  { %v62_v9 = vpop.f32.mrf.mxu0 }
  0x8f   :  { %v66_v10 = vadd.f32 %v62_v9, %v23_v7 }
  0x90   :  { %v73_v11 = vld [vmem:[#allocation2] sm:$0xff] }
  0x91   :  { %v79_v12 = vadd.f32 %v125_v8, %v73_v11  ;;  %69 = vst.msk [vmem:[#allocation2 + $0x8] sm:$0xff] %vm19_vm0, %v66_v10 }
  0x93   :  { %v81_v13 = vmul.f32 %v79_v12, %v79_v12 }
  0x95   :  { %v83_v14 = vmul.f32 %v81_v13, %v79_v12 }
  0x97   :  { %v85_v15 = vmul.f32 0.044715, %v83_v14 }
  0x98   :  { %v74_v16 = vld [vmem:[#allocation2 + $0x8] sm:$0xff] }
  0x99   :  { %v87_v17 = vadd.f32 %v85_v15, %v79_v12  ;;  %v80_v18 = vadd.f32 %v125_v8, %v74_v16 }
  0x9b   :  { %v89_v19 = vmul.f32 0.7978846, %v87_v17  ;;  %v82_v20 = vmul.f32 %v80_v18, %v80_v18 }
  0x9d   :  { %126 = vtanh.f32 %v89_v19  ;;  %v84_v21 = vmul.f32 %v82_v20, %v80_v18 }
  0x9f   :  { %v86_v22 = vmul.f32 0.044715, %v84_v21 }
  0xa1   :  { %v88_v23 = vadd.f32 %v86_v22, %v80_v18 }
  0xa3   :  { %v127_v24 = vpop.eup %126  ;;  %v90_v25 = vmul.f32 0.7978846, %v88_v23 }
  0xa4   :  { %v93_v26 = vadd.f32 1.0, %v127_v24 }
  0xa5   :  { %128 = vtanh.f32 %v90_v25 }
  0xa6   :  { %v95_v27 = vmul.f32 0.5, %v93_v26 }
  0xa8   :  { %v97_v28 = vmul.f32 %v95_v27, %v79_v12 }
  0xaa   :  { %v99_v29 = vpack.c.bf16 %v97_v28, %v97_v28 }
  0xab   :  { %v129_v30 = vpop.eup %128 }
  0xac   :  { %102 = vst.msk [vmem:[%s176_s3] sm:$0xf] %vm101_vm2, %v99_v29  ;;  %v94_v31 = vadd.f32 1.0, %v129_v30 }
  0xae   :  { %v96_v32 = vmul.f32 0.5, %v94_v31 }
  0xb0   :  { %v98_v33 = vmul.f32 %v96_v32, %v80_v18 }
  0xb2   :  { %v100_v34 = vpack.c.bf16 %v98_v33, %v98_v33 }
  0xb4   :  { %103 = vst.msk [vmem:[%s176_s3 + $0x4] sm:$0xf] %vm101_vm2, %v100_v34 }

// kernel: perturb_model_forward.36
= control target key start
LH: loop header
LB: loop body
LE: loop exit
PB: predicated region body
PF: predicated region fallthrough
CT: control target
= control target key end

     0   :  { %s276_s9 = smov 0   ;;  %s296_s0 = inlined_call_operand.vmem [shape: bf16[2,8,32], index: 0, kind: input, shape index: {}]   ;;  %s297_s1 = inlined_call_operand.vmem [shape: f32[2,8,1], index: 1, kind: input, shape index: {}]   ;;  %s298_s2 = inlined_call_operand.vmem [shape: f32[2,1,32], index: 2, kind: output, shape index: {}]  }
   0x1 LB: > { %s233_s10 = sadd.s32 4294967295, %s258_s9   ;;  %p237_p0 = scmp.ge.s32.totalorder %s258_s9, 1  ;;  %s258_s9 = sphi %s276_s9, %s12_s9  }
   0x2   : > { %p120_p1 = scmp.lt.s32.totalorder %s258_s9, 3 }
   0x4   : > { %p121_p2 = pnand %p237_p0, %p120_p1 }
   0x5   : > { %p143_p3 = scmp.lt.s32.totalorder (!%p121_p2), %s233_s10, 1 }
   0x6   : > { %124 = sbr.rel (%p121_p2) target bundleno = 148 (0x94), region = 28 }
   0xb   : > { %v260_v0 = vmov 0   ;;  %s300_s10 = smov (!%p143_p3, %s233_s10), 1  ;;  %vm163_vm0 = vcmask 261120   ;;  %vm172_vm1 = vcmask 253952  }
   0xc   : > { %251 = vset.pattern.permute.xlu0 %v260_v0  ;;  %s239_s11 = sshll.u32 %s300_s10, 3  ;;  %s238_s15 = sshll.u32 %s300_s10, 2 }
   0xd   : > { %s150_s14 = scalar_lea.vmem %s297_s1, %s239_s11  ;;  %s146_s18 = scalar_lea.vmem %s296_s0, %s238_s15 }
   0xe   : > { %v156_v1 = vld [vmem:[%s150_s14] sm:$0xff]  ;;  %s153_s21 = scalar_lea.vmem %s298_s2, %s300_s10 }
   0xf   : > { %159 = vperm.xlu0 %251, %v156_v1   ;;  %v154_v2 = vld [vmem:[%s146_s18] sm:$0xf] }
  0x10   : > { %v155_v3 = vunpack.c.l.bf16 %v154_v2 }
  0x81   : > { %v160_v4 = vpop.permute.xlu0 %159 }
  0x82   : > { %v162_v5 = vmul.f32 %v160_v4, %v155_v3 }
  0x84   : > { %v164_v6 = vsel %vm163_vm0, %v162_v5, 0.0 }
  0x85   : > { %v165_v7 = vrot.slane %v164_v6, 4 }
  0x87   : > { %v166_v8 = vadd.f32 %v165_v7, %v164_v6 }
  0x89   : > { %v167_v9 = vrot.slane %v166_v8, 2 }
  0x8b   : > { %v168_v10 = vadd.f32 %v167_v9, %v166_v8 }
  0x8d   : > { %v169_v11 = vrot.slane %v168_v10, 1 }
  0x8f   : > { %v170_v12 = vadd.f32 %v169_v11, %v168_v10 }
  0x91   : > { %v171_v13 = vmul.f32 0.125, %v170_v12 }
  0x93   : > { %173 = vst.msk [vmem:[%s153_s21] sm:$0x1] %vm172_vm1, %v171_v13 }
  0x94 PF: > { %s12_s9 = sadd.s32 1, %s258_s9  }
  0x95   : > { %p9_p4 = scmp.ge.s32.totalorder %s12_s9, 4  }
  0x97   :  { %11 = sbr.rel (!%p9_p4) target bundleno = 1 (0x1), region = 61 }

// kernel: perturb_model_forward.30
= control target key start
LH: loop header
LB: loop body
LE: loop exit
PB: predicated region body
PF: predicated region fallthrough
CT: control target
= control target key end

     0   :  { %vm28_vm0 = vcmask 261120   ;;  %v225_v1 = vmov 0.0   ;;  %vm72_vm1 = vcmask 523264   ;;  %v226_v24 = vmov 32.0   ;;  %s303_s1 = inlined_call_operand.vmem [shape: bf16[64,32], index: 1, kind: input, shape index: {}]   ;;  %s304_s0 = inlined_call_operand.vmem [shape: bf16[16,64], index: 0, kind: input, shape index: {}]   ;;  %s305_s2 = inlined_call_operand.vmem [shape: f32[1,32], index: 2, kind: input, shape index: {}]   ;;  %s306_s3 = inlined_call_operand.vmem [shape: bf16[16,32], index: 3, kind: input, shape index: {}]   ;;  %s307_s4 = inlined_call_operand.vmem [shape: f32[1,32], index: 4, kind: input, shape index: {}]   ;;  %s308_s5 = inlined_call_operand.vmem [shape: f32[1,32], index: 5, kind: input, shape index: {}]   ;;  %s309_s6 = inlined_call_operand.vmem [shape: bf16[16,32], index: 6, kind: output, shape index: {}]  }
   0x1   :  { %v209_v0 = vld [vmem:[%s303_s1 + $0x18] sm:$0xff]  ;;  %29 = vst.msk [vmem:[#allocation2] sm:$0xff] %vm28_vm0, %v225_v1  ;;  %v208_v2 = vld [vmem:[%s303_s1 + $0x10] sm:$0xff]  ;;  %v207_v3 = vld [vmem:[%s303_s1 + $0x8] sm:$0xff]  ;;  %219 = vrcp.f32 %v226_v24  ;;  %vm177_vm7 = vcmask 257024  }
   0x2   :  { %30 = vst.msk [vmem:[#allocation2 + $0x8] sm:$0xff] %vm28_vm0, %v225_v1  ;;  %80 = vmatpush.bf16.msra.mxu0 %v209_v0  ;;  %v206_v4 = vld [vmem:[%s303_s1] sm:$0xff] }
   0x3   :  { %v205_v5 = vld [vmem:[%s304_s0] sm:$0xff] }
   0x4   :  { %v211_v10 = vld [vmem:[%s306_s3] sm:$0xff]  }
   0x5   :  { %v216_v11 = vld [vmem:[%s305_s2] ss:$0 sm:$0xff]  ;;  %v212_v14 = vunpack.c.l.bf16 %v211_v10  ;;  %v213_v19 = vunpack.c.h.bf16 %v211_v10 }
   0x6   :  { %81 = vmatpush.bf16.msra.mxu0 %v208_v2  ;;  %v217_v55 = vld [vmem:[%s307_s4] ss:$0 sm:$0xff] }
   0x7   :  { %v220_v25 = vpop.eup %219  ;;  %v218_v58 = vld [vmem:[%s308_s5] ss:$0 sm:$0xff] }
   0x8   :  { %v31_v6 = vld [vmem:[#allocation2] sm:$0xff]  ;;  %v119_v26 = vmul.f32 32.0, %v220_v25  ;;  %vm123_vm2 = vweird.f32 %v220_v25 }
   0x9   :  { %v32_v9 = vld [vmem:[#allocation2 + $0x8] sm:$0xff] }
   0xa   :  { %82 = vmatpush.bf16.msra.mxu0 %v207_v3  ;;  %v120_v27 = vsub.f32 1.0, %v119_v26 }
   0xc   :  { %v121_v28 = vmul.f32 %v220_v25, %v120_v27 }
   0xe   :  { %83 = vmatpush.bf16.msra.mxu0 %v206_v4  ;;  %v122_v29 = vadd.f32 %v220_v25, %v121_v28 }
  0x10   :  { %v124_v30 = vsel %vm123_vm2, %v220_v25, %v122_v29 }
  0x11   :  { %204 = vmatmul.msk.bf16.vlgmr.msra.gmra.mxu0 %vm72_vm1, %v205_v5 }
  0x8e   :  { %v85_v7 = vpop.f32.mrf.mxu0 }
  0x8f   :  { %v90_v8 = vadd.f32 %v85_v7, %v31_v6 }
  0x91   :  { %93 = vst.msk [vmem:[#allocation2] sm:$0xff] %vm28_vm0, %v90_v8 }
  0x96   :  { %v87_v12 = vpop.f32.mrf.mxu0 }
  0x97   :  { %v91_v13 = vadd.f32 %v87_v12, %v32_v9 }
  0x98   :  { %v98_v15 = vld [vmem:[#allocation2] sm:$0xff] }
  0x99   :  { %94 = vst.msk [vmem:[#allocation2 + $0x8] sm:$0xff] %vm28_vm0, %v91_v13  ;;  %v104_v16 = vadd.f32 %v216_v11, %v98_v15 }
  0x9b   :  { %v110_v17 = vadd.f32 %v212_v14, %v104_v16 }
  0x9d   :  { %v112_v18 = vsel %vm28_vm0, %v110_v17, 0.0 }
  0x9e   :  { %113 = vadd.xlane.f32.xlu0 %v112_v18 }
  0xa0   :  { %v99_v20 = vld [vmem:[#allocation2 + $0x8] sm:$0xff] }
  0xa1   :  { %v105_v21 = vadd.f32 %v216_v11, %v99_v20 }
  0xa3   :  { %v111_v22 = vadd.f32 %v213_v19, %v105_v21 }
  0xa5   :  { %v115_v23 = vsel %vm28_vm0, %v111_v22, 0.0 }
  0xa6   :  { %116 = vadd.xlane.f32.xlu0 %v115_v23 }
 0x111   :  { %v114_v31 = vpop.xlane.xlu0 %113 }
 0x112   :  { %v125_v32 = vmul.f32 %v124_v30, %v114_v31 }
 0x114   :  { %v127_v33 = vsub.f32 %v110_v17, %v125_v32 }
 0x116   :  { %v129_v34 = vmul.f32 %v127_v33, %v127_v33 }
 0x118   :  { %v131_v35 = vsel %vm28_vm0, %v129_v34, 0.0 }
 0x119   :  { %132 = vadd.xlane.f32.xlu1 %v131_v35  ;;  %v117_v36 = vpop.xlane.xlu0 %116 }
 0x11a   :  { %v126_v37 = vmul.f32 %v124_v30, %v117_v36 }
 0x11c   :  { %v128_v38 = vsub.f32 %v111_v22, %v126_v37 }
 0x11e   :  { %v130_v39 = vmul.f32 %v128_v38, %v128_v38 }
 0x120   :  { %v134_v40 = vsel %vm28_vm0, %v130_v39, 0.0 }
 0x121   :  { %135 = vadd.xlane.f32.xlu1 %v134_v40 }
 0x18c   :  { %v133_v41 = vpop.xlane.xlu1 %132 }
 0x18d   :  { %v137_v42 = vmul.f32 %v133_v41, %v124_v30 }
 0x18f   :  { %v139_v43 = vadd.f32 1e-05, %v137_v42 }
 0x191   :  { %221 = vrsqrt.f32 %v139_v43  ;;  %vm147_vm4 = vweird.f32 %v139_v43 }
 0x194   :  { %v136_v44 = vpop.xlane.xlu1 %135 }
 0x195   :  { %v138_v45 = vmul.f32 %v136_v44, %v124_v30 }
 0x197   :  { %v222_v46 = vpop.eup %221  ;;  %v140_v47 = vadd.f32 1e-05, %v138_v45 }
 0x198   :  { %v142_v48 = vmul.f32 %v222_v46, %v139_v43  ;;  %vm148_vm3 = vweird.f32 %v222_v46 }
 0x199   :  { %223 = vrsqrt.f32 %v140_v47  ;;  %vm149_vm5 = vmor %vm147_vm4, %vm148_vm3  ;;  %vm157_vm8 = vweird.f32 %v140_v47 }
 0x19a   :  { %v143_v49 = vmul.f32 %v222_v46, %v142_v48 }
 0x19c   :  { %v144_v50 = vmul.f32 0.5, %v143_v49 }
 0x19e   :  { %v145_v51 = vsub.f32 1.5, %v144_v50 }
 0x19f   :  { %v224_v52 = vpop.eup %223 }
 0x1a0   :  { %v146_v53 = vmul.f32 %v222_v46, %v145_v51  ;;  %v152_v54 = vmul.f32 %v224_v52, %v140_v47  ;;  %vm158_vm6 = vweird.f32 %v224_v52 }
 0x1a1   :  { %vm159_vm9 = vmor %vm157_vm8, %vm158_vm6 }
 0x1a2   :  { %v150_v56 = vsel %vm149_vm5, %v222_v46, %v146_v53  ;;  %v153_v57 = vmul.f32 %v224_v52, %v152_v54 }
 0x1a3   :  { %v161_v59 = vmul.f32 %v150_v56, %v127_v33 }
 0x1a4   :  { %v154_v60 = vmul.f32 0.5, %v153_v57 }
 0x1a5   :  { %v167_v61 = vmul.f32 %v217_v55, %v161_v59 }
 0x1a6   :  { %v155_v62 = vsub.f32 1.5, %v154_v60 }
 0x1a7   :  { %v173_v63 = vadd.f32 %v218_v58, %v167_v61 }
 0x1a8   :  { %v156_v0 = vmul.f32 %v224_v52, %v155_v62 }
 0x1a9   :  { %v175_v1 = vpack.c.bf16 %v173_v63, %v173_v63 }
 0x1aa   :  { %v160_v2 = vsel %vm159_vm9, %v224_v52, %v156_v0 }
 0x1ab   :  { %178 = vst.msk [vmem:[%s309_s6] sm:$0xf] %vm177_vm7, %v175_v1  ;;  %v162_v3 = vmul.f32 %v160_v2, %v128_v38 }
 0x1ad   :  { %v168_v4 = vmul.f32 %v217_v55, %v162_v3 }
 0x1af   :  { %v174_v5 = vadd.f32 %v218_v58, %v168_v4 }
 0x1b1   :  { %v176_v6 = vpack.c.bf16 %v174_v5, %v174_v5 }
 0x1b3   :  { %179 = vst.msk [vmem:[%s309_s6 + $0x4] sm:$0xf] %vm177_vm7, %v176_v6 }

// kernel: perturb_model_forward.49
= control target key start
LH: loop header
LB: loop body
LE: loop exit
PB: predicated region body
PF: predicated region fallthrough
CT: control target
= control target key end

     0   :  { %15 = vsyncpa [#allocation3], 0  ;;  %s480_s0 = inlined_call_operand.vmem [shape: f32[2,64], index: 0, kind: input, shape index: {}]   ;;  %s481_s1 = inlined_call_operand.vmem [shape: f32[2,8], index: 1, kind: input, shape index: {}]   ;;  %s482_s2 = inlined_call_operand.vmem [shape: bf16[64,64], index: 2, kind: input, shape index: {}]   ;;  %s483_s3 = inlined_call_operand.vmem [shape: f32[1,64], index: 3, kind: input, shape index: {}]   ;;  %s484_s4 = inlined_call_operand.vmem [shape: bf16[64,64], index: 4, kind: input, shape index: {}]   ;;  %s485_s5 = inlined_call_operand.vmem [shape: f32[1,64], index: 5, kind: input, shape index: {}]   ;;  %s486_s6 = inlined_call_operand.vmem [shape: bf16[64,8], index: 6, kind: input, shape index: {}]   ;;  %s487_s7 = inlined_call_operand.vmem [shape: f32[1,8], index: 7, kind: input, shape index: {}]   ;;  %s488_s8 = inlined_call_operand.hbm [shape: f32[2,8], index: 8, kind: output, shape index: {0}]   ;;  %s489_s9 = inlined_call_operand.hbm [shape: f32[1,1], index: 9, kind: output, shape index: {1}]  }
   0x1   :  { %v302_v0 = vld [vmem:[%s482_s2 + $0x18] sm:$0xff]  ;;  %v301_v2 = vld [vmem:[%s482_s2 + $0x10] sm:$0xff] }
   0x2   :  { %v306_v1 = vld [vmem:[%s484_s4 + $0x18] sm:$0xff]  ;;  %80 = vmatpush.bf16.msra.mxu0 %v302_v0  ;;  %v305_v3 = vld [vmem:[%s484_s4 + $0x10] sm:$0xff] }
   0x3   :  { %134 = vmatpush.bf16.msra.mxu1 %v306_v1 }
   0x4   :  { %16 = vsyncpa [#allocation5], 0  ;;  %v300_v4 = vld [vmem:[%s482_s2 + $0x8] sm:$0xff]  ;;  %v299_v5 = vld [vmem:[%s482_s2] sm:$0xff]  ;;  %vm72_vm0 = vcmask 523264   ;;  %vm197_vm1 = vcmask 58368  }
   0x5   :  { %v34_v6 = vld [vmem:[%s480_s0] sm:$0x3]  ;;  %v304_v8 = vld [vmem:[%s484_s4 + $0x8] sm:$0xff]  ;;  %v310_v10 = vld [vmem:[%s486_s6 + $0x18] sm:$0xff]  ;;  %s223_s18 = sshll.u32 %s488_s8, 4  ;;  %s368_s19 = smov [#allocation2]   ;;  %s224_s18 = int_to_ptr.hbm [resolvable:$true] %s223_s18 }
   0x6   :  { %81 = vmatpush.bf16.msra.mxu0 %v301_v2  ;;  %v44_v7 = vpack.c.bf16 %v34_v6, %v34_v6  ;;  %v303_v9 = vld [vmem:[%s484_s4] sm:$0xff]  ;;  %188 = vmatpush.bf16.msra.mxu2 %v310_v10  ;;  %v309_v11 = vld [vmem:[%s486_s6 + $0x10] sm:$0xff]  ;;  %v308_v18 = vld [vmem:[%s486_s6 + $0x8] sm:$0xff]  ;;  %s221_s20 = sshll.u32 %s368_s19, 4  ;;  %vm205_vm2 = vcmask 1041408   ;;  %s234_s8 = sshll.u32 %s489_s9, 4  ;;  %s222_s20 = int_to_ptr.vmem [resolvable:$true] %s221_s20  ;;  %s235_s8 = int_to_ptr.hbm [resolvable:$true] %s234_s8 }
   0x7   :  { %135 = vmatpush.bf16.msra.mxu1 %v305_v3  ;;  %v313_v12 = vld [vmem:[%s483_s3] ss:$0 sm:$0xff]  ;;  %vm214_vm3 = vcmask 0  }
   0x8   :  { %v307_v19 = vld [vmem:[%s486_s6] sm:$0xff] }
   0x9   :  { %v314_v20 = vld [vmem:[%s485_s5] ss:$0 sm:$0xff] }
   0xa   :  { %82 = vmatpush.bf16.msra.mxu0 %v300_v4  ;;  %189 = vmatpush.bf16.msra.mxu2 %v309_v11  ;;  %v315_v26 = vld [vmem:[%s487_s7] ss:$0 sm:$0xff] }
   0xb   :  { %136 = vmatpush.bf16.msra.mxu1 %v304_v8  ;;  %v199_v28 = vld [vmem:[%s481_s1] sm:$0x3]  ;;  %s369_s1 = smov [#allocation4]  }
   0xc   :  { %s232_s7 = sshll.u32 %s369_s1, 4  ;;  %s233_s7 = int_to_ptr.vmem [resolvable:$true] %s232_s7 }
   0xe   :  { %83 = vmatpush.bf16.msra.mxu0 %v299_v5  ;;  %190 = vmatpush.bf16.msra.mxu2 %v308_v18 }
   0xf   :  { %137 = vmatpush.bf16.msra.mxu1 %v303_v9 }
  0x11   :  { %264 = vmatmul.msk.bf16.vlgmr.msra.gmra.mxu0 %vm72_vm0, %v44_v7 }
  0x12   :  { %191 = vmatpush.bf16.msra.mxu2 %v307_v19 }
  0x8e   :  { %v85_v13 = vpop.f32.mrf.mxu0 }
  0x8f   :  { %v86_v14 = vadd.f32 %v313_v12, %v85_v13 }
  0x91   :  { %v89_v15 = vmax.f32 %v86_v14, 0.0 }
  0x93   :  { %v99_v16 = vpack.c.bf16 %v89_v15, %v89_v15 }
  0x95   :  { %281 = vmatmul.msk.bf16.vlgmr.msra.gmra.mxu1 %vm72_vm0, %v99_v16 }
  0x96   :  { %v87_v17 = vpop.f32.mrf.mxu0 }
 0x112   :  { %v139_v21 = vpop.f32.mrf.mxu1 }
 0x113   :  { %v140_v22 = vadd.f32 %v314_v20, %v139_v21 }
 0x115   :  { %v143_v23 = vmax.f32 %v140_v22, 0.0 }
 0x117   :  { %v153_v24 = vpack.c.bf16 %v143_v23, %v143_v23 }
 0x119   :  { %298 = vmatmul.msk.bf16.vlgmr.msra.gmra.mxu2 %vm72_vm0, %v153_v24 }
 0x11a   :  { %v141_v25 = vpop.f32.mrf.mxu1 }
 0x19c   :  { %v193_v27 = vpop.f32.mrf.mxu2 }
 0x19d   :  { %v194_v29 = vadd.f32 %v315_v26, %v193_v27 }
 0x19f   :  { %v200_v30 = vsub.f32 %v194_v29, %v199_v28  ;;  %198 = vst.msk [vmem:[#allocation2] sm:$0x3] %vm197_vm1, %v194_v29 }
 0x1a0   :  { %226 = dma.vmem_to_hbm [thread:$0]  %s222_s20, 32, %s224_s18, [#allocation3]  }
 0x1a1   :  { %v201_v31 = vmul.f32 %v200_v30, %v200_v30 }
 0x1a3   :  { %v202_v32 = vsel %vm197_vm1, %v201_v31, 0.0 }
 0x1a4   :  { %v195_v33 = vpop.f32.mrf.mxu2  ;;  %203 = vadd.xlane.f32.xlu0 %v202_v32 }
 0x217   :  { %v204_v34 = vpop.xlane.xlu0 %203 }
 0x218   :  { %v206_v35 = vsel %vm205_vm2, %v204_v34, 0.0 }
 0x219   :  { %v207_v36 = vrot.slane %v206_v35, 4 }
 0x21b   :  { %v208_v37 = vadd.f32 %v207_v36, %v206_v35 }
 0x21d   :  { %v209_v38 = vrot.slane %v208_v37, 2 }
 0x21f   :  { %v210_v39 = vadd.f32 %v209_v38, %v208_v37 }
 0x221   :  { %v211_v40 = vrot.slane %v210_v39, 1 }
 0x223   :  { %v212_v41 = vadd.f32 %v211_v40, %v210_v39 }
 0x225   :  { %v213_v42 = vmul.f32 0.0625, %v212_v41 }
 0x227   :  { %215 = vst.msk [vmem:[#allocation4] sm:$0x1] %vm214_vm3, %v213_v42 }
 0x228   :  { %237 = dma.vmem_to_hbm [thread:$0]  %s233_s7, 16, %s235_s8, [#allocation5]  }
 0x229   :  { %364 = dma.done.wait [#allocation3], 32  }
 0x22a   :  { %365 = vsyncadd [#allocation3], 4294967264 }
 0x22b   :  { %366 = dma.done.wait [#allocation5], 16  }
 0x22c   :  { %367 = vsyncadd [#allocation5], 4294967280 }
 0x22d   :  { %246 = vsyncpa [#allocation3], 1 }
 0x22e   :  { %247 = vsyncpa [#allocation5], 1 }

</bundles_post_ra>
